<compile_context>
chip_gen: v7x
topology: tpu7x:2x2x1
jax: 0.10.0
libtpu: 0.0.40
codegen_flags: <defaults>
</compile_context>

<pallas_src>
import functools

import jax
import jax.numpy as jnp
import numpy as np
from jax.experimental import pallas as pl
from jax.experimental.pallas import tpu as pltpu


# ---------------------------------------------------------------------------
# Fused kernel: one batch element per grid step, everything in VMEM.
# ---------------------------------------------------------------------------
def _fused_inverted_residual_kernel(*args, stride, use_res, has_expand):
    if has_expand:
        (x_ref, w_pw1_ref, sb_pw1_ref, w_dw_ref, sb_dw_ref, w_pw2_ref,
         sb_pw2_ref, w_mlp1_ref, b_mlp1_ref, w_mlp2_ref, b_mlp2_ref,
         w_sp_ref, bn_sp_ref, o_ref, pad_ref, spad_ref) = args
    else:
        (x_ref, w_dw_ref, sb_dw_ref, w_pw2_ref, sb_pw2_ref,
         w_mlp1_ref, b_mlp1_ref, w_mlp2_ref, b_mlp2_ref,
         w_sp_ref, bn_sp_ref, o_ref, pad_ref, spad_ref) = args
        w_pw1_ref = sb_pw1_ref = None

    _, H, W, Cin = x_ref.shape
    _, Ho, Wo, oup = o_ref.shape
    hidden = w_dw_ref.shape[-1]

    x = x_ref[0]                                          # (H, W, Cin) f32

    # ---- 1x1 expand conv + folded BN + ReLU6 (MXU, bf16 in / f32 acc) ----
    if has_expand:
        xm = x.reshape(H * W, Cin).astype(jnp.bfloat16)
        y = jnp.dot(xm, w_pw1_ref[...], preferred_element_type=jnp.float32)
        y = jnp.clip(y * sb_pw1_ref[0] + sb_pw1_ref[1], 0.0, 6.0)
        y = y.reshape(H, W, hidden)
    else:
        y = x

    # ---- 3x3 depthwise conv (pad=1, stride=s) + folded BN + ReLU6 (VPU) ----
    # Zero-padded copy lives in VMEM scratch; re-initialized every step so the
    # kernel is correct regardless of how grid steps are assigned to cores.
    pad_ref[...] = jnp.zeros_like(pad_ref)
    pad_ref[1:H + 1, 1:W + 1, :] = y
    acc = jnp.zeros((Ho, Wo, hidden), jnp.float32)
    for kh in range(3):
        for kw in range(3):
            if stride == 1:
                patch = pad_ref[kh:kh + Ho, kw:kw + Wo, :]
            else:
                patch = pad_ref[pl.ds(kh, Ho, stride=stride),
                                pl.ds(kw, Wo, stride=stride), :]
            acc = acc + patch * w_dw_ref[kh, kw]
    acc = jnp.clip(acc * sb_dw_ref[0] + sb_dw_ref[1], 0.0, 6.0)

    # ---- 1x1 projection conv + folded BN (no ReLU) (MXU) ----
    zm = acc.reshape(Ho * Wo, hidden).astype(jnp.bfloat16)
    z = jnp.dot(zm, w_pw2_ref[...], preferred_element_type=jnp.float32)
    z = z * sb_pw2_ref[0] + sb_pw2_ref[1]                 # (Ho*Wo, oup)

    # ---- CBAM ChannelGate: global avg pool -> MLP -> sigmoid -> scale ----
    # Lane-dense reduction: channels stay on lanes, reduce over sublanes.
    avg = jnp.sum(z, axis=0, keepdims=True) * (1.0 / (Ho * Wo))   # (1, oup)
    h1 = jnp.maximum(
        jnp.dot(avg, w_mlp1_ref[...], preferred_element_type=jnp.float32)
        + b_mlp1_ref[...], 0.0)
    att = (jnp.dot(h1, w_mlp2_ref[...], preferred_element_type=jnp.float32)
           + b_mlp2_ref[...])
    # NOTE: reproduces the reference ChannelGate bug — the 'max' pool branch
    # re-adds the avg-pool MLP output, so channel_att_sum == 2 * mlp(avg_pool).
    ca = jax.nn.sigmoid(2.0 * att)                        # (1, oup)
    y1 = z * ca                                           # (Ho*Wo, oup)
    y1_3d = y1.reshape(Ho, Wo, oup)

    # ---- CBAM SpatialGate: channel max/mean -> 3x3 conv -> BN -> sigmoid ----
    cmax = jnp.max(y1_3d, axis=-1)                        # (Ho, Wo)
    cmean = jnp.sum(y1_3d, axis=-1) * (1.0 / oup)         # (Ho, Wo)
    spad_ref[...] = jnp.zeros_like(spad_ref)              # zero-padded maps
    spad_ref[0, 1:Ho + 1, 1:Wo + 1] = cmax
    spad_ref[1, 1:Ho + 1, 1:Wo + 1] = cmean
    sacc = jnp.zeros((Ho, Wo), jnp.float32)
    for kh in range(3):
        for kw in range(3):
            base = (kh * 3 + kw) * 2
            sacc = sacc + spad_ref[0, kh:kh + Ho, kw:kw + Wo] * w_sp_ref[base + 0]
            sacc = sacc + spad_ref[1, kh:kh + Ho, kw:kw + Wo] * w_sp_ref[base + 1]
    sa = jax.nn.sigmoid(sacc * bn_sp_ref[0] + bn_sp_ref[1])   # (Ho, Wo)

    out = y1_3d * sa[:, :, None]
    if use_res:
        out = out + x                                     # fused residual add
    o_ref[0] = out.astype(o_ref.dtype)


# ---------------------------------------------------------------------------
# Module wrapper (NCHW in / NCHW out, like the PyTorch module)
# ---------------------------------------------------------------------------
def inverted_residual_forward(x_nchw, p, stride, use_res_connect):
    x = jnp.transpose(x_nchw, (0, 2, 3, 1)).astype(jnp.float32)  # NCHW -> NHWC
    N, H, W, Cin = x.shape
    has_expand = 'w_pw1' in p
    hidden = p['w_dw'].shape[-1]
    oup = p['w_pw2'].shape[1]
    red = p['w_mlp1'].shape[1]
    Ho = (H + 2 - 3) // stride + 1
    Wo = (W + 2 - 3) // stride + 1

    inputs = [x]
    in_specs = [pl.BlockSpec((1, H, W, Cin), lambda n: (n, 0, 0, 0))]
    if has_expand:
        inputs += [p['w_pw1'].astype(jnp.bfloat16),
                   jnp.stack([p['s_pw1'], p['b_pw1']])]
        in_specs += [pl.BlockSpec((Cin, hidden), lambda n: (0, 0)),
                     pl.BlockSpec((2, hidden), lambda n: (0, 0))]
    inputs += [p['w_dw'],
               jnp.stack([p['s_dw'], p['b_dw']]),
               p['w_pw2'].astype(jnp.bfloat16),
               jnp.stack([p['s_pw2'], p['b_pw2']]),
               p['w_mlp1'], p['b_mlp1'].reshape(1, red),
               p['w_mlp2'], p['b_mlp2'].reshape(1, oup),
               p['w_sp'].reshape(-1).astype(jnp.float32),
               jnp.stack([p['s_sp'], p['b_sp']]).astype(jnp.float32)]
    in_specs += [pl.BlockSpec((3, 3, hidden), lambda n: (0, 0, 0)),
                 pl.BlockSpec((2, hidden), lambda n: (0, 0)),
                 pl.BlockSpec((hidden, oup), lambda n: (0, 0)),
                 pl.BlockSpec((2, oup), lambda n: (0, 0)),
                 pl.BlockSpec((oup, red), lambda n: (0, 0)),
                 pl.BlockSpec((1, red), lambda n: (0, 0)),
                 pl.BlockSpec((red, oup), lambda n: (0, 0)),
                 pl.BlockSpec((1, oup), lambda n: (0, 0)),
                 pl.BlockSpec(memory_space=pltpu.MemorySpace.SMEM),
                 pl.BlockSpec(memory_space=pltpu.MemorySpace.SMEM)]

    out = pl.pallas_call(
        functools.partial(_fused_inverted_residual_kernel, stride=stride,
                          use_res=use_res_connect, has_expand=has_expand),
        out_shape=jax.ShapeDtypeStruct((N, Ho, Wo, oup), jnp.float32),
        grid=(N,),
        in_specs=in_specs,
        out_specs=pl.BlockSpec((1, Ho, Wo, oup), lambda n: (n, 0, 0, 0)),
        scratch_shapes=[pltpu.VMEM((H + 2, W + 2, hidden), jnp.float32),
                        pltpu.VMEM((2, Ho + 2, Wo + 2), jnp.float32)],
        compiler_params=pltpu.CompilerParams(
            dimension_semantics=("parallel",)),
    )(*inputs)
    return jnp.transpose(out, (0, 3, 1, 2))  # NHWC -> NCHW


# ---------------------------------------------------------------------------
# Deterministic parameter construction (inference-mode BN folded)
# ---------------------------------------------------------------------------
def init_params(key, inp, oup, expand_ratio):
    hidden = int(round(inp * expand_ratio))
    red = max(oup // 16, 1)
    ks = jax.random.split(key, 12)

    def bn_fold(k, c):
        k1, k2, k3, k4 = jax.random.split(k, 4)
        gamma = 1.0 + 0.1 * jax.random.normal(k1, (c,), jnp.float32)
        beta = 0.1 * jax.random.normal(k2, (c,), jnp.float32)
        mean = 0.1 * jax.random.normal(k3, (c,), jnp.float32)
        var = 1.0 + 0.2 * jax.random.uniform(k4, (c,), jnp.float32)
        scale = gamma / jnp.sqrt(var + 1e-5)
        bias = beta - mean * scale
        return scale, bias

    p = {}
    if expand_ratio != 1:
        p['w_pw1'] = 0.2 * jax.random.normal(ks[0], (inp, hidden), jnp.float32)
        p['s_pw1'], p['b_pw1'] = bn_fold(ks[1], hidden)
    p['w_dw'] = 0.2 * jax.random.normal(ks[2], (3, 3, hidden), jnp.float32)
    p['s_dw'], p['b_dw'] = bn_fold(ks[3], hidden)
    p['w_pw2'] = 0.2 * jax.random.normal(ks[4], (hidden, oup), jnp.float32)
    p['s_pw2'], p['b_pw2'] = bn_fold(ks[5], oup)
    p['w_mlp1'] = 0.2 * jax.random.normal(ks[6], (oup, red), jnp.float32)
    p['b_mlp1'] = 0.1 * jax.random.normal(ks[7], (red,), jnp.float32)
    p['w_mlp2'] = 0.2 * jax.random.normal(ks[8], (red, oup), jnp.float32)
    p['b_mlp2'] = 0.1 * jax.random.normal(ks[9], (oup,), jnp.float32)
    p['w_sp'] = 0.2 * jax.random.normal(ks[10], (3, 3, 2), jnp.float32)
    s, b = bn_fold(ks[11], 1)
    p['s_sp'], p['b_sp'] = s[0], b[0]
    return p


# ---------------------------------------------------------------------------
# Pure-JAX reference (same math, incl. bf16 MXU operands) for verification
# ---------------------------------------------------------------------------
def ref_forward(x_nchw, p, stride, use_res_connect):
    x = jnp.transpose(x_nchw, (0, 2, 3, 1)).astype(jnp.float32)
    N, H, W, Cin = x.shape
    y = x
    if 'w_pw1' in p:
        hidden = p['w_pw1'].shape[1]
        y2 = jnp.dot(y.reshape(-1, Cin).astype(jnp.bfloat16),
                     p['w_pw1'].astype(jnp.bfloat16),
                     preferred_element_type=jnp.float32)
        y = jnp.clip(y2 * p['s_pw1'] + p['b_pw1'], 0.0, 6.0)
        y = y.reshape(N, H, W, hidden)
    C = y.shape[-1]
    ypad = jnp.pad(y, ((0, 0), (1, 1), (1, 1), (0, 0)))
    Ho = (H + 2 - 3) // stride + 1
    Wo = (W + 2 - 3) // stride + 1
    acc = jnp.zeros((N, Ho, Wo, C), jnp.float32)
    for kh in range(3):
        for kw in range(3):
            sl = ypad[:, kh:kh + (Ho - 1) * stride + 1:stride,
                      kw:kw + (Wo - 1) * stride + 1:stride, :]
            acc = acc + sl * p['w_dw'][kh, kw]
    y = jnp.clip(acc * p['s_dw'] + p['b_dw'], 0.0, 6.0)
    oup = p['w_pw2'].shape[1]
    z = jnp.dot(y.reshape(-1, C).astype(jnp.bfloat16),
                p['w_pw2'].astype(jnp.bfloat16),
                preferred_element_type=jnp.float32)
    z = (z * p['s_pw2'] + p['b_pw2']).reshape(N, Ho, Wo, oup)
    avg = jnp.mean(z, axis=(1, 2))
    h1 = jnp.maximum(avg @ p['w_mlp1'] + p['b_mlp1'], 0.0)
    att = h1 @ p['w_mlp2'] + p['b_mlp2']
    ca = jax.nn.sigmoid(2.0 * att)  # avg MLP counted twice (reference bug)
    y1 = z * ca[:, None, None, :]
    cmax = jnp.max(y1, axis=-1)
    cmean = jnp.mean(y1, axis=-1)
    pm = jnp.pad(cmax, ((0, 0), (1, 1), (1, 1)))
    pe = jnp.pad(cmean, ((0, 0), (1, 1), (1, 1)))
    sacc = jnp.zeros((N, Ho, Wo), jnp.float32)
    for kh in range(3):
        for kw in range(3):
            sacc = sacc + pm[:, kh:kh + Ho, kw:kw + Wo] * p['w_sp'][kh, kw, 0]
            sacc = sacc + pe[:, kh:kh + Ho, kw:kw + Wo] * p['w_sp'][kh, kw, 1]
    sa = jax.nn.sigmoid(sacc * p['s_sp'] + p['b_sp'])
    out = y1 * sa[..., None]
    if use_res_connect:
        out = out + x
    return jnp.transpose(out, (0, 3, 1, 2))


if __name__ == "__main__":
    # InvertedResidual(inp=32, oup=32, stride=1, expand_ratio=2)
    inp, oup, stride, expand_ratio = 32, 32, 1, 2
    N, H, W = 2, 8, 8

    key = jax.random.PRNGKey(0)
    kx, kp = jax.random.split(key)
    x = jax.random.normal(kx, (N, inp, H, W), jnp.float32)  # NCHW like PyTorch
    params = init_params(kp, inp, oup, expand_ratio)
    use_res = (stride == 1 and inp == oup)

    out = inverted_residual_forward(x, params, stride, use_res)
    out = jax.block_until_ready(out)

    ref = ref_forward(x, params, stride, use_res)
    assert out.shape == (N, oup, H, W)
    np.testing.assert_allclose(np.asarray(out), np.asarray(ref),
                               rtol=2e-3, atol=2e-3)
    print("KERNEL_OK")
</pallas_src>

<mosaic_0001>
module attributes {stable_mosaic.version = 11 : i64} {
  func.func @_fused_inverted_residual_kernel(%arg0: i32, %arg1: memref<1x8x8x32xf32, #tpu.memory_space<vmem>>, %arg2: memref<32x64xbf16, #tpu.memory_space<vmem>>, %arg3: memref<2x64xf32, #tpu.memory_space<vmem>>, %arg4: memref<3x3x64xf32, #tpu.memory_space<vmem>>, %arg5: memref<2x64xf32, #tpu.memory_space<vmem>>, %arg6: memref<64x32xbf16, #tpu.memory_space<vmem>>, %arg7: memref<2x32xf32, #tpu.memory_space<vmem>>, %arg8: memref<32x2xf32, #tpu.memory_space<vmem>>, %arg9: memref<1x2xf32, #tpu.memory_space<vmem>>, %arg10: memref<2x32xf32, #tpu.memory_space<vmem>>, %arg11: memref<1x32xf32, #tpu.memory_space<vmem>>, %arg12: memref<18xf32, #tpu.memory_space<smem>>, %arg13: memref<2xf32, #tpu.memory_space<smem>>, %arg14: memref<1x8x8x32xf32, #tpu.memory_space<vmem>>, %arg15: memref<10x10x64xf32, #tpu.memory_space<vmem>>, %arg16: memref<2x10x10xf32, #tpu.memory_space<vmem>>) attributes {dimension_semantics = [#tpu.dimension_semantics<parallel>], iteration_bounds = array<i64: 2>, scalar_prefetch = 0 : i64, scratch_operands = 2 : i64, tpu.core_type = #tpu.core_type<tc>, window_params = [{transform_indices = @transform_0, window_bounds = array<i64: 1, 8, 8, 32>}, {pipeline_mode = #tpu.pipeline_mode<synchronous>, transform_indices = @transform_1, window_bounds = array<i64: 32, 64>}, {pipeline_mode = #tpu.pipeline_mode<synchronous>, transform_indices = @transform_2, window_bounds = array<i64: 2, 64>}, {pipeline_mode = #tpu.pipeline_mode<synchronous>, transform_indices = @transform_3, window_bounds = array<i64: 3, 3, 64>}, {pipeline_mode = #tpu.pipeline_mode<synchronous>, transform_indices = @transform_4, window_bounds = array<i64: 2, 64>}, {pipeline_mode = #tpu.pipeline_mode<synchronous>, transform_indices = @transform_5, window_bounds = array<i64: 64, 32>}, {pipeline_mode = #tpu.pipeline_mode<synchronous>, transform_indices = @transform_6, window_bounds = array<i64: 2, 32>}, {pipeline_mode = #tpu.pipeline_mode<synchronous>, transform_indices = @transform_7, window_bounds = array<i64: 32, 2>}, {pipeline_mode = #tpu.pipeline_mode<synchronous>, transform_indices = @transform_8, window_bounds = array<i64: 1, 2>}, {pipeline_mode = #tpu.pipeline_mode<synchronous>, transform_indices = @transform_9, window_bounds = array<i64: 2, 32>}, {pipeline_mode = #tpu.pipeline_mode<synchronous>, transform_indices = @transform_10, window_bounds = array<i64: 1, 32>}, {transform_indices = @transform_11, window_bounds = array<i64: 18>}, {transform_indices = @transform_12, window_bounds = array<i64: 2>}, {transform_indices = @transform_13, window_bounds = array<i64: 1, 8, 8, 32>}]} {
    %c0 = arith.constant 0 : index
    %c0_0 = arith.constant 0 : index
    %c0_1 = arith.constant 0 : index
    %c0_2 = arith.constant 0 : index
    %0 = vector.load %arg1[%c0, %c0_0, %c0_1, %c0_2] : memref<1x8x8x32xf32, #tpu.memory_space<vmem>>, vector<1x8x8x32xf32>
    %1 = vector.shape_cast %0 : vector<1x8x8x32xf32> to vector<8x8x32xf32>
    %2 = vector.shape_cast %1 : vector<8x8x32xf32> to vector<64x32xf32>
    %3 = arith.truncf %2 : vector<64x32xf32> to vector<64x32xbf16>
    %c0_3 = arith.constant 0 : index
    %c0_4 = arith.constant 0 : index
    %4 = vector.load %arg2[%c0_3, %c0_4] : memref<32x64xbf16, #tpu.memory_space<vmem>>, vector<32x64xbf16>
    %cst = arith.constant dense<0.000000e+00> : vector<64x64xf32>
    %5 = tpu.matmul %3, %4, %cst {dimension_numbers = #tpu.dot_dimension_numbers<[1], [0], [0], [1], [0, 0, 1, 1], [], []>} : vector<64x32xbf16>, vector<32x64xbf16>, vector<64x64xf32> -> vector<64x64xf32>
    %c0_5 = arith.constant 0 : index
    %c0_6 = arith.constant 0 : index
    %6 = vector.load %arg3[%c0_5, %c0_6] : memref<2x64xf32, #tpu.memory_space<vmem>>, vector<1x64xf32>
    %7 = vector.shape_cast %6 : vector<1x64xf32> to vector<64xf32>
    %8 = vector.shape_cast %7 : vector<64xf32> to vector<1x64xf32>
    %9 = vector.broadcast %8 : vector<1x64xf32> to vector<64x64xf32>
    %10 = arith.mulf %5, %9 : vector<64x64xf32>
    %c1 = arith.constant 1 : index
    %c0_7 = arith.constant 0 : index
    %11 = vector.load %arg3[%c1, %c0_7] : memref<2x64xf32, #tpu.memory_space<vmem>>, vector<1x64xf32>
    %12 = vector.shape_cast %11 : vector<1x64xf32> to vector<64xf32>
    %13 = vector.shape_cast %12 : vector<64xf32> to vector<1x64xf32>
    %14 = vector.broadcast %13 : vector<1x64xf32> to vector<64x64xf32>
    %15 = arith.addf %10, %14 : vector<64x64xf32>
    %cst_8 = arith.constant 0.000000e+00 : f32
    %cst_9 = arith.constant 6.000000e+00 : f32
    %16 = vector.broadcast %cst_8 : f32 to vector<64x64xf32>
    %17 = arith.maximumf %16, %15 : vector<64x64xf32>
    %18 = vector.broadcast %cst_9 : f32 to vector<64x64xf32>
    %19 = arith.minimumf %18, %17 : vector<64x64xf32>
    %20 = vector.shape_cast %19 : vector<64x64xf32> to vector<8x8x64xf32>
    %cst_10 = arith.constant 0.000000e+00 : f32
    %21 = vector.broadcast %cst_10 : f32 to vector<10x10x64xf32>
    %c0_11 = arith.constant 0 : index
    %c0_12 = arith.constant 0 : index
    %c0_13 = arith.constant 0 : index
    %22 = vector.load %arg15[%c0_11, %c0_12, %c0_13] : memref<10x10x64xf32, #tpu.memory_space<vmem>>, vector<10x10x64xf32>
    tpu.vector_store %arg15[%c0_11, %c0_12, %c0_13], %21 {strides = array<i32>} : memref<10x10x64xf32, #tpu.memory_space<vmem>>, vector<10x10x64xf32>,
    %c1_14 = arith.constant 1 : index
    %c1_15 = arith.constant 1 : index
    %c0_16 = arith.constant 0 : index
    %23 = vector.load %arg15[%c1_14, %c1_15, %c0_16] : memref<10x10x64xf32, #tpu.memory_space<vmem>>, vector<8x8x64xf32>
    tpu.vector_store %arg15[%c1_14, %c1_15, %c0_16], %20 {strides = array<i32>} : memref<10x10x64xf32, #tpu.memory_space<vmem>>, vector<8x8x64xf32>,
    %cst_17 = arith.constant 0.000000e+00 : f32
    %24 = vector.broadcast %cst_17 : f32 to vector<8x8x64xf32>
    %c0_18 = arith.constant 0 : index
    %c0_19 = arith.constant 0 : index
    %c0_20 = arith.constant 0 : index
    %25 = vector.load %arg15[%c0_18, %c0_19, %c0_20] : memref<10x10x64xf32, #tpu.memory_space<vmem>>, vector<8x8x64xf32>
    %c0_21 = arith.constant 0 : index
    %c0_22 = arith.constant 0 : index
    %c0_23 = arith.constant 0 : index
    %26 = vector.load %arg4[%c0_21, %c0_22, %c0_23] : memref<3x3x64xf32, #tpu.memory_space<vmem>>, vector<1x1x64xf32>
    %27 = vector.shape_cast %26 : vector<1x1x64xf32> to vector<64xf32>
    %28 = vector.shape_cast %27 : vector<64xf32> to vector<1x1x64xf32>
    %29 = vector.broadcast %28 : vector<1x1x64xf32> to vector<8x8x64xf32>
    %30 = arith.mulf %25, %29 : vector<8x8x64xf32>
    %31 = arith.addf %24, %30 : vector<8x8x64xf32>
    %c0_24 = arith.constant 0 : index
    %c1_25 = arith.constant 1 : index
    %c0_26 = arith.constant 0 : index
    %32 = vector.load %arg15[%c0_24, %c1_25, %c0_26] : memref<10x10x64xf32, #tpu.memory_space<vmem>>, vector<8x8x64xf32>
    %c0_27 = arith.constant 0 : index
    %c1_28 = arith.constant 1 : index
    %c0_29 = arith.constant 0 : index
    %33 = vector.load %arg4[%c0_27, %c1_28, %c0_29] : memref<3x3x64xf32, #tpu.memory_space<vmem>>, vector<1x1x64xf32>
    %34 = vector.shape_cast %33 : vector<1x1x64xf32> to vector<64xf32>
    %35 = vector.shape_cast %34 : vector<64xf32> to vector<1x1x64xf32>
    %36 = vector.broadcast %35 : vector<1x1x64xf32> to vector<8x8x64xf32>
    %37 = arith.mulf %32, %36 : vector<8x8x64xf32>
    %38 = arith.addf %31, %37 : vector<8x8x64xf32>
    %c0_30 = arith.constant 0 : index
    %c2 = arith.constant 2 : index
    %c0_31 = arith.constant 0 : index
    %39 = vector.load %arg15[%c0_30, %c2, %c0_31] : memref<10x10x64xf32, #tpu.memory_space<vmem>>, vector<8x8x64xf32>
    %c0_32 = arith.constant 0 : index
    %c2_33 = arith.constant 2 : index
    %c0_34 = arith.constant 0 : index
    %40 = vector.load %arg4[%c0_32, %c2_33, %c0_34] : memref<3x3x64xf32, #tpu.memory_space<vmem>>, vector<1x1x64xf32>
    %41 = vector.shape_cast %40 : vector<1x1x64xf32> to vector<64xf32>
    %42 = vector.shape_cast %41 : vector<64xf32> to vector<1x1x64xf32>
    %43 = vector.broadcast %42 : vector<1x1x64xf32> to vector<8x8x64xf32>
    %44 = arith.mulf %39, %43 : vector<8x8x64xf32>
    %45 = arith.addf %38, %44 : vector<8x8x64xf32>
    %c1_35 = arith.constant 1 : index
    %c0_36 = arith.constant 0 : index
    %c0_37 = arith.constant 0 : index
    %46 = vector.load %arg15[%c1_35, %c0_36, %c0_37] : memref<10x10x64xf32, #tpu.memory_space<vmem>>, vector<8x8x64xf32>
    %c1_38 = arith.constant 1 : index
    %c0_39 = arith.constant 0 : index
    %c0_40 = arith.constant 0 : index
    %47 = vector.load %arg4[%c1_38, %c0_39, %c0_40] : memref<3x3x64xf32, #tpu.memory_space<vmem>>, vector<1x1x64xf32>
    %48 = vector.shape_cast %47 : vector<1x1x64xf32> to vector<64xf32>
    %49 = vector.shape_cast %48 : vector<64xf32> to vector<1x1x64xf32>
    %50 = vector.broadcast %49 : vector<1x1x64xf32> to vector<8x8x64xf32>
    %51 = arith.mulf %46, %50 : vector<8x8x64xf32>
    %52 = arith.addf %45, %51 : vector<8x8x64xf32>
    %c1_41 = arith.constant 1 : index
    %c1_42 = arith.constant 1 : index
    %c0_43 = arith.constant 0 : index
    %53 = vector.load %arg15[%c1_41, %c1_42, %c0_43] : memref<10x10x64xf32, #tpu.memory_space<vmem>>, vector<8x8x64xf32>
    %c1_44 = arith.constant 1 : index
    %c1_45 = arith.constant 1 : index
    %c0_46 = arith.constant 0 : index
    %54 = vector.load %arg4[%c1_44, %c1_45, %c0_46] : memref<3x3x64xf32, #tpu.memory_space<vmem>>, vector<1x1x64xf32>
    %55 = vector.shape_cast %54 : vector<1x1x64xf32> to vector<64xf32>
    %56 = vector.shape_cast %55 : vector<64xf32> to vector<1x1x64xf32>
    %57 = vector.broadcast %56 : vector<1x1x64xf32> to vector<8x8x64xf32>
    %58 = arith.mulf %53, %57 : vector<8x8x64xf32>
    %59 = arith.addf %52, %58 : vector<8x8x64xf32>
    %c1_47 = arith.constant 1 : index
    %c2_48 = arith.constant 2 : index
    %c0_49 = arith.constant 0 : index
    %60 = vector.load %arg15[%c1_47, %c2_48, %c0_49] : memref<10x10x64xf32, #tpu.memory_space<vmem>>, vector<8x8x64xf32>
    %c1_50 = arith.constant 1 : index
    %c2_51 = arith.constant 2 : index
    %c0_52 = arith.constant 0 : index
    %61 = vector.load %arg4[%c1_50, %c2_51, %c0_52] : memref<3x3x64xf32, #tpu.memory_space<vmem>>, vector<1x1x64xf32>
    %62 = vector.shape_cast %61 : vector<1x1x64xf32> to vector<64xf32>
    %63 = vector.shape_cast %62 : vector<64xf32> to vector<1x1x64xf32>
    %64 = vector.broadcast %63 : vector<1x1x64xf32> to vector<8x8x64xf32>
    %65 = arith.mulf %60, %64 : vector<8x8x64xf32>
    %66 = arith.addf %59, %65 : vector<8x8x64xf32>
    %c2_53 = arith.constant 2 : index
    %c0_54 = arith.constant 0 : index
    %c0_55 = arith.constant 0 : index
    %67 = vector.load %arg15[%c2_53, %c0_54, %c0_55] : memref<10x10x64xf32, #tpu.memory_space<vmem>>, vector<8x8x64xf32>
    %c2_56 = arith.constant 2 : index
    %c0_57 = arith.constant 0 : index
    %c0_58 = arith.constant 0 : index
    %68 = vector.load %arg4[%c2_56, %c0_57, %c0_58] : memref<3x3x64xf32, #tpu.memory_space<vmem>>, vector<1x1x64xf32>
    %69 = vector.shape_cast %68 : vector<1x1x64xf32> to vector<64xf32>
    %70 = vector.shape_cast %69 : vector<64xf32> to vector<1x1x64xf32>
    %71 = vector.broadcast %70 : vector<1x1x64xf32> to vector<8x8x64xf32>
    %72 = arith.mulf %67, %71 : vector<8x8x64xf32>
    %73 = arith.addf %66, %72 : vector<8x8x64xf32>
    %c2_59 = arith.constant 2 : index
    %c1_60 = arith.constant 1 : index
    %c0_61 = arith.constant 0 : index
    %74 = vector.load %arg15[%c2_59, %c1_60, %c0_61] : memref<10x10x64xf32, #tpu.memory_space<vmem>>, vector<8x8x64xf32>
    %c2_62 = arith.constant 2 : index
    %c1_63 = arith.constant 1 : index
    %c0_64 = arith.constant 0 : index
    %75 = vector.load %arg4[%c2_62, %c1_63, %c0_64] : memref<3x3x64xf32, #tpu.memory_space<vmem>>, vector<1x1x64xf32>
    %76 = vector.shape_cast %75 : vector<1x1x64xf32> to vector<64xf32>
    %77 = vector.shape_cast %76 : vector<64xf32> to vector<1x1x64xf32>
    %78 = vector.broadcast %77 : vector<1x1x64xf32> to vector<8x8x64xf32>
    %79 = arith.mulf %74, %78 : vector<8x8x64xf32>
    %80 = arith.addf %73, %79 : vector<8x8x64xf32>
    %c2_65 = arith.constant 2 : index
    %c2_66 = arith.constant 2 : index
    %c0_67 = arith.constant 0 : index
    %81 = vector.load %arg15[%c2_65, %c2_66, %c0_67] : memref<10x10x64xf32, #tpu.memory_space<vmem>>, vector<8x8x64xf32>
    %c2_68 = arith.constant 2 : index
    %c2_69 = arith.constant 2 : index
    %c0_70 = arith.constant 0 : index
    %82 = vector.load %arg4[%c2_68, %c2_69, %c0_70] : memref<3x3x64xf32, #tpu.memory_space<vmem>>, vector<1x1x64xf32>
    %83 = vector.shape_cast %82 : vector<1x1x64xf32> to vector<64xf32>
    %84 = vector.shape_cast %83 : vector<64xf32> to vector<1x1x64xf32>
    %85 = vector.broadcast %84 : vector<1x1x64xf32> to vector<8x8x64xf32>
    %86 = arith.mulf %81, %85 : vector<8x8x64xf32>
    %87 = arith.addf %80, %86 : vector<8x8x64xf32>
    %c0_71 = arith.constant 0 : index
    %c0_72 = arith.constant 0 : index
    %88 = vector.load %arg5[%c0_71, %c0_72] : memref<2x64xf32, #tpu.memory_space<vmem>>, vector<1x64xf32>
    %89 = vector.shape_cast %88 : vector<1x64xf32> to vector<64xf32>
    %90 = vector.shape_cast %89 : vector<64xf32> to vector<1x1x64xf32>
    %91 = vector.broadcast %90 : vector<1x1x64xf32> to vector<8x8x64xf32>
    %92 = arith.mulf %87, %91 : vector<8x8x64xf32>
    %c1_73 = arith.constant 1 : index
    %c0_74 = arith.constant 0 : index
    %93 = vector.load %arg5[%c1_73, %c0_74] : memref<2x64xf32, #tpu.memory_space<vmem>>, vector<1x64xf32>
    %94 = vector.shape_cast %93 : vector<1x64xf32> to vector<64xf32>
    %95 = vector.shape_cast %94 : vector<64xf32> to vector<1x1x64xf32>
    %96 = vector.broadcast %95 : vector<1x1x64xf32> to vector<8x8x64xf32>
    %97 = arith.addf %92, %96 : vector<8x8x64xf32>
    %cst_75 = arith.constant 0.000000e+00 : f32
    %cst_76 = arith.constant 6.000000e+00 : f32
    %98 = vector.broadcast %cst_75 : f32 to vector<8x8x64xf32>
    %99 = arith.maximumf %98, %97 : vector<8x8x64xf32>
    %100 = vector.broadcast %cst_76 : f32 to vector<8x8x64xf32>
    %101 = arith.minimumf %100, %99 : vector<8x8x64xf32>
    %102 = vector.shape_cast %101 : vector<8x8x64xf32> to vector<64x64xf32>
    %103 = arith.truncf %102 : vector<64x64xf32> to vector<64x64xbf16>
    %c0_77 = arith.constant 0 : index
    %c0_78 = arith.constant 0 : index
    %104 = vector.load %arg6[%c0_77, %c0_78] : memref<64x32xbf16, #tpu.memory_space<vmem>>, vector<64x32xbf16>
    %cst_79 = arith.constant dense<0.000000e+00> : vector<64x32xf32>
    %105 = tpu.matmul %103, %104, %cst_79 {dimension_numbers = #tpu.dot_dimension_numbers<[1], [0], [0], [1], [0, 0, 1, 1], [], []>} : vector<64x64xbf16>, vector<64x32xbf16>, vector<64x32xf32> -> vector<64x32xf32>
    %c0_80 = arith.constant 0 : index
    %c0_81 = arith.constant 0 : index
    %106 = vector.load %arg7[%c0_80, %c0_81] : memref<2x32xf32, #tpu.memory_space<vmem>>, vector<1x32xf32>
    %107 = vector.shape_cast %106 : vector<1x32xf32> to vector<32xf32>
    %108 = vector.shape_cast %107 : vector<32xf32> to vector<1x32xf32>
    %109 = vector.broadcast %108 : vector<1x32xf32> to vector<64x32xf32>
    %110 = arith.mulf %105, %109 : vector<64x32xf32>
    %c1_82 = arith.constant 1 : index
    %c0_83 = arith.constant 0 : index
    %111 = vector.load %arg7[%c1_82, %c0_83] : memref<2x32xf32, #tpu.memory_space<vmem>>, vector<1x32xf32>
    %112 = vector.shape_cast %111 : vector<1x32xf32> to vector<32xf32>
    %113 = vector.shape_cast %112 : vector<32xf32> to vector<1x32xf32>
    %114 = vector.broadcast %113 : vector<1x32xf32> to vector<64x32xf32>
    %115 = arith.addf %110, %114 : vector<64x32xf32>
    %cst_84 = arith.constant dense<0.000000e+00> : vector<32xf32>
    %116 = vector.multi_reduction <add>, %115, %cst_84 [0] : vector<64x32xf32> to vector<32xf32>
    %117 = vector.shape_cast %116 : vector<32xf32> to vector<1x32xf32>
    %cst_85 = arith.constant 1.562500e-02 : f32
    %118 = vector.broadcast %cst_85 : f32 to vector<1x32xf32>
    %119 = arith.mulf %117, %118 : vector<1x32xf32>
    %c0_86 = arith.constant 0 : index
    %c0_87 = arith.constant 0 : index
    %120 = vector.load %arg8[%c0_86, %c0_87] : memref<32x2xf32, #tpu.memory_space<vmem>>, vector<32x2xf32>
    %cst_88 = arith.constant dense<0.000000e+00> : vector<1x2xf32>
    %121 = tpu.matmul %119, %120, %cst_88 {dimension_numbers = #tpu.dot_dimension_numbers<[1], [0], [0], [1], [0, 0, 1, 1], [], []>} : vector<1x32xf32>, vector<32x2xf32>, vector<1x2xf32> -> vector<1x2xf32>
    %c0_89 = arith.constant 0 : index
    %c0_90 = arith.constant 0 : index
    %122 = vector.load %arg9[%c0_89, %c0_90] : memref<1x2xf32, #tpu.memory_space<vmem>>, vector<1x2xf32>
    %123 = arith.addf %121, %122 : vector<1x2xf32>
    %cst_91 = arith.constant 0.000000e+00 : f32
    %124 = vector.broadcast %cst_91 : f32 to vector<1x2xf32>
    %125 = arith.maximumf %123, %124 : vector<1x2xf32>
    %c0_92 = arith.constant 0 : index
    %c0_93 = arith.constant 0 : index
    %126 = vector.load %arg10[%c0_92, %c0_93] : memref<2x32xf32, #tpu.memory_space<vmem>>, vector<2x32xf32>
    %cst_94 = arith.constant dense<0.000000e+00> : vector<1x32xf32>
    %127 = tpu.matmul %125, %126, %cst_94 {dimension_numbers = #tpu.dot_dimension_numbers<[1], [0], [0], [1], [0, 0, 1, 1], [], []>} : vector<1x2xf32>, vector<2x32xf32>, vector<1x32xf32> -> vector<1x32xf32>
    %c0_95 = arith.constant 0 : index
    %c0_96 = arith.constant 0 : index
    %128 = vector.load %arg11[%c0_95, %c0_96] : memref<1x32xf32, #tpu.memory_space<vmem>>, vector<1x32xf32>
    %129 = arith.addf %127, %128 : vector<1x32xf32>
    %cst_97 = arith.constant 2.000000e+00 : f32
    %130 = vector.broadcast %cst_97 : f32 to vector<1x32xf32>
    %131 = arith.mulf %130, %129 : vector<1x32xf32>
    %132 = arith.negf %131 : vector<1x32xf32>
    %133 = math.exp %132 : vector<1x32xf32>
    %cst_98 = arith.constant 1.000000e+00 : f32
    %134 = vector.broadcast %cst_98 : f32 to vector<1x32xf32>
    %135 = arith.addf %134, %133 : vector<1x32xf32>
    %136 = arith.divf %134, %135 : vector<1x32xf32>
    %137 = vector.broadcast %136 : vector<1x32xf32> to vector<64x32xf32>
    %138 = arith.mulf %115, %137 : vector<64x32xf32>
    %139 = vector.shape_cast %138 : vector<64x32xf32> to vector<8x8x32xf32>
    %cst_99 = arith.constant dense<0xFF800000> : vector<8x8xf32>
    %140 = vector.multi_reduction <maximumf>, %139, %cst_99 [2] : vector<8x8x32xf32> to vector<8x8xf32>
    %cst_100 = arith.constant dense<0.000000e+00> : vector<8x8xf32>
    %141 = vector.multi_reduction <add>, %139, %cst_100 [2] : vector<8x8x32xf32> to vector<8x8xf32>
    %cst_101 = arith.constant 3.125000e-02 : f32
    %142 = vector.broadcast %cst_101 : f32 to vector<8x8xf32>
    %143 = arith.mulf %141, %142 : vector<8x8xf32>
    %cst_102 = arith.constant 0.000000e+00 : f32
    %144 = vector.broadcast %cst_102 : f32 to vector<2x10x10xf32>
    %c0_103 = arith.constant 0 : index
    %c0_104 = arith.constant 0 : index
    %c0_105 = arith.constant 0 : index
    %145 = vector.load %arg16[%c0_103, %c0_104, %c0_105] : memref<2x10x10xf32, #tpu.memory_space<vmem>>, vector<2x10x10xf32>
    tpu.vector_store %arg16[%c0_103, %c0_104, %c0_105], %144 {strides = array<i32>} : memref<2x10x10xf32, #tpu.memory_space<vmem>>, vector<2x10x10xf32>,
    %c0_106 = arith.constant 0 : index
    %c1_107 = arith.constant 1 : index
    %c1_108 = arith.constant 1 : index
    %146 = vector.load %arg16[%c0_106, %c1_107, %c1_108] : memref<2x10x10xf32, #tpu.memory_space<vmem>>, vector<1x8x8xf32>
    %147 = vector.shape_cast %146 : vector<1x8x8xf32> to vector<8x8xf32>
    %148 = vector.shape_cast %140 : vector<8x8xf32> to vector<1x8x8xf32>
    tpu.vector_store %arg16[%c0_106, %c1_107, %c1_108], %148 {strides = array<i32>} : memref<2x10x10xf32, #tpu.memory_space<vmem>>, vector<1x8x8xf32>,
    %c1_109 = arith.constant 1 : index
    %c1_110 = arith.constant 1 : index
    %c1_111 = arith.constant 1 : index
    %149 = vector.load %arg16[%c1_109, %c1_110, %c1_111] : memref<2x10x10xf32, #tpu.memory_space<vmem>>, vector<1x8x8xf32>
    %150 = vector.shape_cast %149 : vector<1x8x8xf32> to vector<8x8xf32>
    %151 = vector.shape_cast %143 : vector<8x8xf32> to vector<1x8x8xf32>
    tpu.vector_store %arg16[%c1_109, %c1_110, %c1_111], %151 {strides = array<i32>} : memref<2x10x10xf32, #tpu.memory_space<vmem>>, vector<1x8x8xf32>,
    %cst_112 = arith.constant 0.000000e+00 : f32
    %152 = vector.broadcast %cst_112 : f32 to vector<8x8xf32>
    %c0_113 = arith.constant 0 : index
    %c0_114 = arith.constant 0 : index
    %c0_115 = arith.constant 0 : index
    %153 = vector.load %arg16[%c0_113, %c0_114, %c0_115] : memref<2x10x10xf32, #tpu.memory_space<vmem>>, vector<1x8x8xf32>
    %154 = vector.shape_cast %153 : vector<1x8x8xf32> to vector<8x8xf32>
    %c0_116 = arith.constant 0 : index
    %155 = memref.load %arg12[%c0_116] : memref<18xf32, #tpu.memory_space<smem>>
    %156 = vector.broadcast %155 : f32 to vector<8x8xf32>
    %157 = arith.mulf %154, %156 : vector<8x8xf32>
    %158 = arith.addf %152, %157 : vector<8x8xf32>
    %c1_117 = arith.constant 1 : index
    %c0_118 = arith.constant 0 : index
    %c0_119 = arith.constant 0 : index
    %159 = vector.load %arg16[%c1_117, %c0_118, %c0_119] : memref<2x10x10xf32, #tpu.memory_space<vmem>>, vector<1x8x8xf32>
    %160 = vector.shape_cast %159 : vector<1x8x8xf32> to vector<8x8xf32>
    %c1_120 = arith.constant 1 : index
    %161 = memref.load %arg12[%c1_120] : memref<18xf32, #tpu.memory_space<smem>>
    %162 = vector.broadcast %161 : f32 to vector<8x8xf32>
    %163 = arith.mulf %160, %162 : vector<8x8xf32>
    %164 = arith.addf %158, %163 : vector<8x8xf32>
    %c0_121 = arith.constant 0 : index
    %c0_122 = arith.constant 0 : index
    %c1_123 = arith.constant 1 : index
    %165 = vector.load %arg16[%c0_121, %c0_122, %c1_123] : memref<2x10x10xf32, #tpu.memory_space<vmem>>, vector<1x8x8xf32>
    %166 = vector.shape_cast %165 : vector<1x8x8xf32> to vector<8x8xf32>
    %c2_124 = arith.constant 2 : index
    %167 = memref.load %arg12[%c2_124] : memref<18xf32, #tpu.memory_space<smem>>
    %168 = vector.broadcast %167 : f32 to vector<8x8xf32>
    %169 = arith.mulf %166, %168 : vector<8x8xf32>
    %170 = arith.addf %164, %169 : vector<8x8xf32>
    %c1_125 = arith.constant 1 : index
    %c0_126 = arith.constant 0 : index
    %c1_127 = arith.constant 1 : index
    %171 = vector.load %arg16[%c1_125, %c0_126, %c1_127] : memref<2x10x10xf32, #tpu.memory_space<vmem>>, vector<1x8x8xf32>
    %172 = vector.shape_cast %171 : vector<1x8x8xf32> to vector<8x8xf32>
    %c3 = arith.constant 3 : index
    %173 = memref.load %arg12[%c3] : memref<18xf32, #tpu.memory_space<smem>>
    %174 = vector.broadcast %173 : f32 to vector<8x8xf32>
    %175 = arith.mulf %172, %174 : vector<8x8xf32>
    %176 = arith.addf %170, %175 : vector<8x8xf32>
    %c0_128 = arith.constant 0 : index
    %c0_129 = arith.constant 0 : index
    %c2_130 = arith.constant 2 : index
    %177 = vector.load %arg16[%c0_128, %c0_129, %c2_130] : memref<2x10x10xf32, #tpu.memory_space<vmem>>, vector<1x8x8xf32>
    %178 = vector.shape_cast %177 : vector<1x8x8xf32> to vector<8x8xf32>
    %c4 = arith.constant 4 : index
    %179 = memref.load %arg12[%c4] : memref<18xf32, #tpu.memory_space<smem>>
    %180 = vector.broadcast %179 : f32 to vector<8x8xf32>
    %181 = arith.mulf %178, %180 : vector<8x8xf32>
    %182 = arith.addf %176, %181 : vector<8x8xf32>
    %c1_131 = arith.constant 1 : index
    %c0_132 = arith.constant 0 : index
    %c2_133 = arith.constant 2 : index
    %183 = vector.load %arg16[%c1_131, %c0_132, %c2_133] : memref<2x10x10xf32, #tpu.memory_space<vmem>>, vector<1x8x8xf32>
    %184 = vector.shape_cast %183 : vector<1x8x8xf32> to vector<8x8xf32>
    %c5 = arith.constant 5 : index
    %185 = memref.load %arg12[%c5] : memref<18xf32, #tpu.memory_space<smem>>
    %186 = vector.broadcast %185 : f32 to vector<8x8xf32>
    %187 = arith.mulf %184, %186 : vector<8x8xf32>
    %188 = arith.addf %182, %187 : vector<8x8xf32>
    %c0_134 = arith.constant 0 : index
    %c1_135 = arith.constant 1 : index
    %c0_136 = arith.constant 0 : index
    %189 = vector.load %arg16[%c0_134, %c1_135, %c0_136] : memref<2x10x10xf32, #tpu.memory_space<vmem>>, vector<1x8x8xf32>
    %190 = vector.shape_cast %189 : vector<1x8x8xf32> to vector<8x8xf32>
    %c6 = arith.constant 6 : index
    %191 = memref.load %arg12[%c6] : memref<18xf32, #tpu.memory_space<smem>>
    %192 = vector.broadcast %191 : f32 to vector<8x8xf32>
    %193 = arith.mulf %190, %192 : vector<8x8xf32>
    %194 = arith.addf %188, %193 : vector<8x8xf32>
    %c1_137 = arith.constant 1 : index
    %c1_138 = arith.constant 1 : index
    %c0_139 = arith.constant 0 : index
    %195 = vector.load %arg16[%c1_137, %c1_138, %c0_139] : memref<2x10x10xf32, #tpu.memory_space<vmem>>, vector<1x8x8xf32>
    %196 = vector.shape_cast %195 : vector<1x8x8xf32> to vector<8x8xf32>
    %c7 = arith.constant 7 : index
    %197 = memref.load %arg12[%c7] : memref<18xf32, #tpu.memory_space<smem>>
    %198 = vector.broadcast %197 : f32 to vector<8x8xf32>
    %199 = arith.mulf %196, %198 : vector<8x8xf32>
    %200 = arith.addf %194, %199 : vector<8x8xf32>
    %c0_140 = arith.constant 0 : index
    %c1_141 = arith.constant 1 : index
    %c1_142 = arith.constant 1 : index
    %201 = vector.load %arg16[%c0_140, %c1_141, %c1_142] : memref<2x10x10xf32, #tpu.memory_space<vmem>>, vector<1x8x8xf32>
    %202 = vector.shape_cast %201 : vector<1x8x8xf32> to vector<8x8xf32>
    %c8 = arith.constant 8 : index
    %203 = memref.load %arg12[%c8] : memref<18xf32, #tpu.memory_space<smem>>
    %204 = vector.broadcast %203 : f32 to vector<8x8xf32>
    %205 = arith.mulf %202, %204 : vector<8x8xf32>
    %206 = arith.addf %200, %205 : vector<8x8xf32>
    %c1_143 = arith.constant 1 : index
    %c1_144 = arith.constant 1 : index
    %c1_145 = arith.constant 1 : index
    %207 = vector.load %arg16[%c1_143, %c1_144, %c1_145] : memref<2x10x10xf32, #tpu.memory_space<vmem>>, vector<1x8x8xf32>
    %208 = vector.shape_cast %207 : vector<1x8x8xf32> to vector<8x8xf32>
    %c9 = arith.constant 9 : index
    %209 = memref.load %arg12[%c9] : memref<18xf32, #tpu.memory_space<smem>>
    %210 = vector.broadcast %209 : f32 to vector<8x8xf32>
    %211 = arith.mulf %208, %210 : vector<8x8xf32>
    %212 = arith.addf %206, %211 : vector<8x8xf32>
    %c0_146 = arith.constant 0 : index
    %c1_147 = arith.constant 1 : index
    %c2_148 = arith.constant 2 : index
    %213 = vector.load %arg16[%c0_146, %c1_147, %c2_148] : memref<2x10x10xf32, #tpu.memory_space<vmem>>, vector<1x8x8xf32>
    %214 = vector.shape_cast %213 : vector<1x8x8xf32> to vector<8x8xf32>
    %c10 = arith.constant 10 : index
    %215 = memref.load %arg12[%c10] : memref<18xf32, #tpu.memory_space<smem>>
    %216 = vector.broadcast %215 : f32 to vector<8x8xf32>
    %217 = arith.mulf %214, %216 : vector<8x8xf32>
    %218 = arith.addf %212, %217 : vector<8x8xf32>
    %c1_149 = arith.constant 1 : index
    %c1_150 = arith.constant 1 : index
    %c2_151 = arith.constant 2 : index
    %219 = vector.load %arg16[%c1_149, %c1_150, %c2_151] : memref<2x10x10xf32, #tpu.memory_space<vmem>>, vector<1x8x8xf32>
    %220 = vector.shape_cast %219 : vector<1x8x8xf32> to vector<8x8xf32>
    %c11 = arith.constant 11 : index
    %221 = memref.load %arg12[%c11] : memref<18xf32, #tpu.memory_space<smem>>
    %222 = vector.broadcast %221 : f32 to vector<8x8xf32>
    %223 = arith.mulf %220, %222 : vector<8x8xf32>
    %224 = arith.addf %218, %223 : vector<8x8xf32>
    %c0_152 = arith.constant 0 : index
    %c2_153 = arith.constant 2 : index
    %c0_154 = arith.constant 0 : index
    %225 = vector.load %arg16[%c0_152, %c2_153, %c0_154] : memref<2x10x10xf32, #tpu.memory_space<vmem>>, vector<1x8x8xf32>
    %226 = vector.shape_cast %225 : vector<1x8x8xf32> to vector<8x8xf32>
    %c12 = arith.constant 12 : index
    %227 = memref.load %arg12[%c12] : memref<18xf32, #tpu.memory_space<smem>>
    %228 = vector.broadcast %227 : f32 to vector<8x8xf32>
    %229 = arith.mulf %226, %228 : vector<8x8xf32>
    %230 = arith.addf %224, %229 : vector<8x8xf32>
    %c1_155 = arith.constant 1 : index
    %c2_156 = arith.constant 2 : index
    %c0_157 = arith.constant 0 : index
    %231 = vector.load %arg16[%c1_155, %c2_156, %c0_157] : memref<2x10x10xf32, #tpu.memory_space<vmem>>, vector<1x8x8xf32>
    %232 = vector.shape_cast %231 : vector<1x8x8xf32> to vector<8x8xf32>
    %c13 = arith.constant 13 : index
    %233 = memref.load %arg12[%c13] : memref<18xf32, #tpu.memory_space<smem>>
    %234 = vector.broadcast %233 : f32 to vector<8x8xf32>
    %235 = arith.mulf %232, %234 : vector<8x8xf32>
    %236 = arith.addf %230, %235 : vector<8x8xf32>
    %c0_158 = arith.constant 0 : index
    %c2_159 = arith.constant 2 : index
    %c1_160 = arith.constant 1 : index
    %237 = vector.load %arg16[%c0_158, %c2_159, %c1_160] : memref<2x10x10xf32, #tpu.memory_space<vmem>>, vector<1x8x8xf32>
    %238 = vector.shape_cast %237 : vector<1x8x8xf32> to vector<8x8xf32>
    %c14 = arith.constant 14 : index
    %239 = memref.load %arg12[%c14] : memref<18xf32, #tpu.memory_space<smem>>
    %240 = vector.broadcast %239 : f32 to vector<8x8xf32>
    %241 = arith.mulf %238, %240 : vector<8x8xf32>
    %242 = arith.addf %236, %241 : vector<8x8xf32>
    %c1_161 = arith.constant 1 : index
    %c2_162 = arith.constant 2 : index
    %c1_163 = arith.constant 1 : index
    %243 = vector.load %arg16[%c1_161, %c2_162, %c1_163] : memref<2x10x10xf32, #tpu.memory_space<vmem>>, vector<1x8x8xf32>
    %244 = vector.shape_cast %243 : vector<1x8x8xf32> to vector<8x8xf32>
    %c15 = arith.constant 15 : index
    %245 = memref.load %arg12[%c15] : memref<18xf32, #tpu.memory_space<smem>>
    %246 = vector.broadcast %245 : f32 to vector<8x8xf32>
    %247 = arith.mulf %244, %246 : vector<8x8xf32>
    %248 = arith.addf %242, %247 : vector<8x8xf32>
    %c0_164 = arith.constant 0 : index
    %c2_165 = arith.constant 2 : index
    %c2_166 = arith.constant 2 : index
    %249 = vector.load %arg16[%c0_164, %c2_165, %c2_166] : memref<2x10x10xf32, #tpu.memory_space<vmem>>, vector<1x8x8xf32>
    %250 = vector.shape_cast %249 : vector<1x8x8xf32> to vector<8x8xf32>
    %c16 = arith.constant 16 : index
    %251 = memref.load %arg12[%c16] : memref<18xf32, #tpu.memory_space<smem>>
    %252 = vector.broadcast %251 : f32 to vector<8x8xf32>
    %253 = arith.mulf %250, %252 : vector<8x8xf32>
    %254 = arith.addf %248, %253 : vector<8x8xf32>
    %c1_167 = arith.constant 1 : index
    %c2_168 = arith.constant 2 : index
    %c2_169 = arith.constant 2 : index
    %255 = vector.load %arg16[%c1_167, %c2_168, %c2_169] : memref<2x10x10xf32, #tpu.memory_space<vmem>>, vector<1x8x8xf32>
    %256 = vector.shape_cast %255 : vector<1x8x8xf32> to vector<8x8xf32>
    %c17 = arith.constant 17 : index
    %257 = memref.load %arg12[%c17] : memref<18xf32, #tpu.memory_space<smem>>
    %258 = vector.broadcast %257 : f32 to vector<8x8xf32>
    %259 = arith.mulf %256, %258 : vector<8x8xf32>
    %260 = arith.addf %254, %259 : vector<8x8xf32>
    %c0_170 = arith.constant 0 : index
    %261 = memref.load %arg13[%c0_170] : memref<2xf32, #tpu.memory_space<smem>>
    %262 = vector.broadcast %261 : f32 to vector<8x8xf32>
    %263 = arith.mulf %260, %262 : vector<8x8xf32>
    %c1_171 = arith.constant 1 : index
    %264 = memref.load %arg13[%c1_171] : memref<2xf32, #tpu.memory_space<smem>>
    %265 = vector.broadcast %264 : f32 to vector<8x8xf32>
    %266 = arith.addf %263, %265 : vector<8x8xf32>
    %267 = arith.negf %266 : vector<8x8xf32>
    %268 = math.exp %267 : vector<8x8xf32>
    %cst_172 = arith.constant 1.000000e+00 : f32
    %269 = vector.broadcast %cst_172 : f32 to vector<8x8xf32>
    %270 = arith.addf %269, %268 : vector<8x8xf32>
    %271 = arith.divf %269, %270 : vector<8x8xf32>
    %272 = vector.shape_cast %271 : vector<8x8xf32> to vector<8x8x1xf32>
    %273 = vector.broadcast %272 : vector<8x8x1xf32> to vector<8x8x32xf32>
    %274 = arith.mulf %139, %273 : vector<8x8x32xf32>
    %275 = arith.addf %274, %1 : vector<8x8x32xf32>
    %c0_173 = arith.constant 0 : index
    %c0_174 = arith.constant 0 : index
    %c0_175 = arith.constant 0 : index
    %c0_176 = arith.constant 0 : index
    %276 = vector.load %arg14[%c0_173, %c0_174, %c0_175, %c0_176] : memref<1x8x8x32xf32, #tpu.memory_space<vmem>>, vector<1x8x8x32xf32>
    %277 = vector.shape_cast %276 : vector<1x8x8x32xf32> to vector<8x8x32xf32>
    %278 = vector.shape_cast %275 : vector<8x8x32xf32> to vector<1x8x8x32xf32>
    tpu.vector_store %arg14[%c0_173, %c0_174, %c0_175, %c0_176], %278 {strides = array<i32>} : memref<1x8x8x32xf32, #tpu.memory_space<vmem>>, vector<1x8x8x32xf32>,
    return
  }
  func.func @transform_0(%arg0: i32) -> (i32, i32, i32, i32) {
    %c0_i32 = arith.constant 0 : i32
    %c0_i32_0 = arith.constant 0 : i32
    %c0_i32_1 = arith.constant 0 : i32
    %c0_i32_2 = arith.constant 0 : i32
    return %arg0, %c0_i32, %c0_i32_0, %c0_i32_1 : i32, i32, i32, i32
  }
  func.func @transform_1(%arg0: i32) -> (i32, i32) {
    %c0_i32 = arith.constant 0 : i32
    %c0_i32_0 = arith.constant 0 : i32
    %c0_i32_1 = arith.constant 0 : i32
    return %c0_i32, %c0_i32_0 : i32, i32
  }
  func.func @transform_2(%arg0: i32) -> (i32, i32) {
    %c0_i32 = arith.constant 0 : i32
    %c0_i32_0 = arith.constant 0 : i32
    %c0_i32_1 = arith.constant 0 : i32
    return %c0_i32, %c0_i32_0 : i32, i32
  }
  func.func @transform_3(%arg0: i32) -> (i32, i32, i32) {
    %c0_i32 = arith.constant 0 : i32
    %c0_i32_0 = arith.constant 0 : i32
    %c0_i32_1 = arith.constant 0 : i32
    %c0_i32_2 = arith.constant 0 : i32
    return %c0_i32, %c0_i32_0, %c0_i32_1 : i32, i32, i32
  }
  func.func @transform_4(%arg0: i32) -> (i32, i32) {
    %c0_i32 = arith.constant 0 : i32
    %c0_i32_0 = arith.constant 0 : i32
    %c0_i32_1 = arith.constant 0 : i32
    return %c0_i32, %c0_i32_0 : i32, i32
  }
  func.func @transform_5(%arg0: i32) -> (i32, i32) {
    %c0_i32 = arith.constant 0 : i32
    %c0_i32_0 = arith.constant 0 : i32
    %c0_i32_1 = arith.constant 0 : i32
    return %c0_i32, %c0_i32_0 : i32, i32
  }
  func.func @transform_6(%arg0: i32) -> (i32, i32) {
    %c0_i32 = arith.constant 0 : i32
    %c0_i32_0 = arith.constant 0 : i32
    %c0_i32_1 = arith.constant 0 : i32
    return %c0_i32, %c0_i32_0 : i32, i32
  }
  func.func @transform_7(%arg0: i32) -> (i32, i32) {
    %c0_i32 = arith.constant 0 : i32
    %c0_i32_0 = arith.constant 0 : i32
    %c0_i32_1 = arith.constant 0 : i32
    return %c0_i32, %c0_i32_0 : i32, i32
  }
  func.func @transform_8(%arg0: i32) -> (i32, i32) {
    %c0_i32 = arith.constant 0 : i32
    %c0_i32_0 = arith.constant 0 : i32
    %c0_i32_1 = arith.constant 0 : i32
    return %c0_i32, %c0_i32_0 : i32, i32
  }
  func.func @transform_9(%arg0: i32) -> (i32, i32) {
    %c0_i32 = arith.constant 0 : i32
    %c0_i32_0 = arith.constant 0 : i32
    %c0_i32_1 = arith.constant 0 : i32
    return %c0_i32, %c0_i32_0 : i32, i32
  }
  func.func @transform_10(%arg0: i32) -> (i32, i32) {
    %c0_i32 = arith.constant 0 : i32
    %c0_i32_0 = arith.constant 0 : i32
    %c0_i32_1 = arith.constant 0 : i32
    return %c0_i32, %c0_i32_0 : i32, i32
  }
  func.func @transform_11(%arg0: i32) -> i32 {
    %c0_i32 = arith.constant 0 : i32
    %c0_i32_0 = arith.constant 0 : i32
    return %c0_i32 : i32
  }
  func.func @transform_12(%arg0: i32) -> i32 {
    %c0_i32 = arith.constant 0 : i32
    %c0_i32_0 = arith.constant 0 : i32
    return %c0_i32 : i32
  }
  func.func @transform_13(%arg0: i32) -> (i32, i32, i32, i32) {
    %c0_i32 = arith.constant 0 : i32
    %c0_i32_0 = arith.constant 0 : i32
    %c0_i32_1 = arith.constant 0 : i32
    %c0_i32_2 = arith.constant 0 : i32
    return %arg0, %c0_i32, %c0_i32_0, %c0_i32_1 : i32, i32, i32, i32
  }
}

</mosaic_0001>

<bundles_post_ra>
// kernel: tpu_custom_call.1
= control target key start
LH: loop header
LB: loop body
LE: loop exit
PB: predicated region body
PF: predicated region fallthrough
CT: control target
= control target key end

     0   :  { %s2929_s0 = inlined_call_operand.hbm [shape: f32[2,8,8,32], index: 0, kind: input, shape index: {}]   ;;  %s2930_s1 = inlined_call_operand.vmem [shape: bf16[32,64], index: 1, kind: input, shape index: {}]   ;;  %s2931_s2 = inlined_call_operand.vmem [shape: f32[2,64], index: 2, kind: input, shape index: {}]   ;;  %s2932_s3 = inlined_call_operand.vmem [shape: f32[3,3,64], index: 3, kind: input, shape index: {}]   ;;  %s2933_s4 = inlined_call_operand.vmem [shape: f32[2,64], index: 4, kind: input, shape index: {}]   ;;  %s2934_s5 = inlined_call_operand.vmem [shape: bf16[64,32], index: 5, kind: input, shape index: {}]   ;;  %s2935_s6 = inlined_call_operand.vmem [shape: f32[2,32], index: 6, kind: input, shape index: {}]   ;;  %s2936_s7 = inlined_call_operand.vmem [shape: f32[32,2], index: 7, kind: input, shape index: {}]   ;;  %s2937_s8 = inlined_call_operand.vmem [shape: f32[1,2], index: 8, kind: input, shape index: {}]   ;;  %s2938_s9 = inlined_call_operand.vmem [shape: f32[2,32], index: 9, kind: input, shape index: {}]   ;;  %s2939_s10 = inlined_call_operand.vmem [shape: f32[1,32], index: 10, kind: input, shape index: {}]   ;;  %s2940_s11 = inlined_call_operand.vmem [shape: f32[18], index: 11, kind: input, shape index: {}]   ;;  %s2941_s12 = inlined_call_operand.vmem [shape: f32[2], index: 12, kind: input, shape index: {}]   ;;  %s2942_s13 = inlined_call_operand.hbm [shape: f32[2,8,8,32], index: 13, kind: output, shape index: {}]  }
   0x1   :  { %2953 = sst [smem:[#allocation21_spill]] %s2940_s11 }
   0x2   :  { %2954 = sst [smem:[#allocation22_spill]] %s2941_s12 }
   0x3   :  { %18 = vsyncpa [#allocation5], 0 }
   0x4   :  { %20 = vsyncpa [#allocation5 + $0x1], 0 }
   0x5   :  { %21 = vsyncpa [#allocation7], 0 }
   0x6   :  { %22 = vsyncpa [#allocation10], 0 }
   0x7   :  { %23 = vsyncpa [#allocation6], 0 }
   0x8   :  { %25 = vsyncpa [#allocation6 + $0x1], 0  ;;  %s2276_s25 = smov 0   ;;  %s2278_s26 = smov 0  }
   0x9   :  { %s2280_s27 = smov 0   ;;  %s2282_s28 = smov 0  }
   0xa LB: > { %2955 = sst [smem:[#allocation16_spill]] %s2179_s25  ;;  %s2297_s29 = sadd.s32 4294967295, %s2191_s28   ;;  %s2191_s28 = sphi %s2282_s28, %s2981_s28   ;;  %s2187_s27 = sphi %s2280_s27, %s2983_s27   ;;  %s2183_s26 = sphi %s2278_s26, %s2985_s26   ;;  %s2179_s25 = sphi %s2276_s25, %s2984_s25  }
   0xb   : > { %2956 = sst [smem:[#allocation17_spill]] %s2187_s27  ;;  %s1810_s30 = sadd.s32 4294967294, %s2191_s28  }
   0xc   : > { %s2301_s14 = sadd.s32 1, %s2191_s28   ;;  %s38_s15 = sadd.s32 1, %s2187_s27 }
   0xd   : > { %2957 = sst [smem:[#allocation18_spill]] %s2301_s14  ;;  %s35_s16 = ssub.s32 %s2191_s28, %s2301_s14 }
   0xe   : > { %p45_p0 = scmp.ne.s32.totalorder %s2187_s27, %s2183_s26  ;;  %p36_p1 = scmp.eq.s32.totalorder %s35_s16, 0 }
   0xf   : > { %p46_p2 = scmp.eq.s32.totalorder %s2191_s28, 0  ;;  %p51_p3 = scmp.ne.s32.totalorder %s2183_s26, %s2179_s25 }
  0x10   : > { %p2945_p4 = scmp.eq.s32.totalorder %s2297_s29, 0  ;;  %p327_p7 = scmp.eq.s32.totalorder %s2297_s29, 1 }
  0x11   : > { %s2313_s17 = scalar_select %p36_p1, %s2187_s27, %s38_s15  }
  0x12   : > { %p2315_p5 = por %p46_p2, %p45_p0  ;;  %p2321_p6 = por %p2945_p4, %p51_p3 }
  0x13   : > { %2958 = sst [smem:[#allocation19_spill]] %s2313_s17  ;;  %p333_p8 = scmp.eq.s32.totalorder %s1810_s30, 1 }
  0x14   : > { %s2960_s19 = scalar_select %p2321_p6, 1, 0 }
  0x15   : > { %p1811_p9 = scmp.ge.s32.totalorder %s2191_s28, 1  ;;  %p340_p10 = scmp.lt.s32.totalorder %s2191_s28, 3 }
  0x16   : > { %p2328_p11 = por %p327_p7, %p45_p0  ;;  %p2332_p12 = por %p333_p8, %p51_p3 }
  0x17   : > { %p2336_p13 = pnand %p1811_p9, %p340_p10  ;;  %s2965_s11 = sld [smem:[#allocation21_spill]] }
  0x18   : > { %s2961_s20 = scalar_select %p2328_p11, 1, 0 }
  0x19   : > { %s2962_s21 = scalar_select %p2332_p12, 1, 0 }
  0x1a   : > { %s2964_s22 = scalar_select %p2336_p13, 1, 0 }
  0x1b   : > { %2963 = sst [smem:[#allocation20_spill]] %s2962_s21  ;;  %p1971_p1 = pneg %p2336_p13 }
  0x1c   : > { %p1988_p2 = scmp.lt.s32.totalorder %s2191_s28, 2  ;;  %s2967_s12 = sld [smem:[#allocation22_spill]] }
  0x1d   : > { %s383_s15 = sshll.u32 %s2965_s11, 4  ;;  %p2349_p7 = pnand %p1971_p1, %p2945_p4  ;;  %s384_s15 = int_to_ptr.vmem [resolvable:$true] %s383_s15 }
  0x1e   : > { %p2358_p3 = pnand %p1988_p2, %p2315_p5  ;;  %s2057_s24 = scalar_lea.vmem %s384_s15, 16 }
  0x1f   : > { %p2058_p8 = scmp.ne.s32.totalorder %s384_s15, %s2057_s24  ;;  %p2059_p9 = pneg %p2349_p7 }
  0x20   : > { %s2968_s23 = scalar_select %p2358_p3, 1, 0 }
  0x21   : > { %p2060_p10 = pnand %p2059_p9, %p2058_p8  ;;  %p2065_p0 = scmp.lt.s32.totalorder %s384_s15, %s384_s15 }
  0x22   : > { %s394_s14 = sshll.u32 %s2967_s12, 4  ;;  %p2066_p4 = scmp.lt.s32.totalorder %s2057_s24, %s2057_s24  ;;  %s395_s14 = int_to_ptr.vmem [resolvable:$true] %s394_s14 }
  0x23   : > { %p2061_p1 = pneg %p2060_p10 }
  0x24   : > { %p2067_p12 = por %p2066_p4, %p2065_p0 }
  0x26   : > { %p2068_p11 = pnand %p2067_p12, %p2061_p1 }
  0x28   : > { %2071 = shalt.err (!%p2068_p11)
}
  0x29   : > { %s2193_s17 = smov [#allocation8]   ;;  %s405_s18 = sand.u32 1, %s2187_s27  }
  0x2a   : > { %1974 = dma.vmem_to_smem (!%p2349_p7), %s384_s15, 16, %s2193_s17, [#allocation7]  }
  0x2b   : > { %s2072_s16 = scalar_lea.vmem %s395_s14, 16  ;;  %p2080_p8 = scmp.lt.s32.totalorder %s395_s14, %s395_s14 }
  0x2c   : > { %p2073_p5 = scmp.ne.s32.totalorder %s395_s14, %s2072_s16  ;;  %p2081_p10 = scmp.lt.s32.totalorder %s2072_s16, %s2072_s16 }
  0x2e   : > { %p2075_p2 = pnand %p2073_p5, %p2059_p9  ;;  %p2082_p13 = por %p2081_p10, %p2080_p8 }
  0x30   : > { %p2076_p6 = pneg %p2075_p2 }
  0x32   : > { %p2083_p3 = pnand %p2082_p13, %p2076_p6 }
  0x34   : > { %2086 = shalt.err (!%p2083_p3)
}
  0x35   : > { %s2194_s24 = smov [#allocation9]   ;;  %s1815_s15 = sshll.u32 %s405_s18, 6 }
  0x36   : > { %1977 = dma.vmem_to_smem (!%p2349_p7), %s395_s14, 16, %s2194_s24, [#allocation10]  }
  0x37   : > { %s1886_s17 = sshll.u32 %s2191_s28, 10  ;;  %s409_s16 = scalar_lea.vmem [#allocation4], %s1815_s15 }
  0x38   : > { %s2379_s27 = scalar_lea.hbm %s2929_s0, %s1886_s17  ;;  %s416_s21 = sshll.u32 %s409_s16, 4  ;;  %s2381_s21 = int_to_ptr.vmem [resolvable:$true] %s416_s21 }
  0x39   : > { %s2383_s30 = scalar_lea.sflag [#allocation5], %s405_s18  ;;  %s2087_s25 = scalar_lea.hbm %s2379_s27, 1024 }
  0x3a   : > { %p2088_p4 = scmp.ne.s32.totalorder %s2379_s27, %s2087_s25  ;;  %p2969_p6 = scmp.ne.s32.totalorder %s2968_s23, 0 }
  0x3b   : > { %s2092_s14 = scalar_lea.hbm %s2929_s0, 2048  ;;  %p2093_p0 = scmp.lt.u32.totalorder %s2379_s27, %s2929_s0 }
  0x3c   : > { %p2089_p11 = pneg %p2969_p6  ;;  %p2094_p7 = scmp.lt.u32.totalorder %s2092_s14, %s2087_s25 }
  0x3d   : > { %p2096_p9 = scmp.lt.u32.totalorder %s2087_s25, %s2379_s27 }
  0x3e   : > { %p2090_p12 = pnand %p2089_p11, %p2088_p4  ;;  %p2095_p3 = por %p2094_p7, %p2093_p0 }
  0x40   : > { %p2091_p13 = pneg %p2090_p12  ;;  %p2097_p1 = por %p2096_p9, %p2095_p3 }
  0x42   : > { %p2098_p5 = pnand %p2097_p1, %p2091_p13 }
  0x44   : > { %2101 = shalt.err (!%p2098_p5)
}
  0x45   : > { %s2102_s18 = scalar_lea.vmem %s2381_s21, 1024  ;;  %s2195_s15 = smov [#allocation4]  }
  0x46   : > { %p2103_p2 = scmp.ne.s32.totalorder %s2381_s21, %s2102_s18  ;;  %s2107_s16 = sshll.u32 %s2195_s15, 4  ;;  %s2108_s16 = int_to_ptr.vmem [resolvable:$false] %s2107_s16 }
  0x47   : > { %s2109_s11 = scalar_lea.vmem %s2108_s16, 2048  ;;  %p2110_p4 = scmp.lt.s32.totalorder %s2381_s21, %s2108_s16 }
  0x48   : > { %p2105_p8 = pnand %p2103_p2, %p2089_p11  ;;  %p2111_p12 = scmp.lt.s32.totalorder %s2109_s11, %s2102_s18 }
  0x4a   : > { %p2106_p10 = pneg %p2105_p8  ;;  %p2112_p0 = por %p2111_p12, %p2110_p4 }
  0x4c   : > { %p2113_p7 = pnand %p2112_p0, %p2106_p10 }
  0x4e   : > { %2116 = shalt.err (!%p2113_p7)
}
  0x4f   : > { %s2196_s25 = smov 128   ;;  %s2197_s12 = smov 8  }
  0x50   : > { %1981 = dma.hbm_to_vmem [thread:$0]  (!%p2969_p6), %s2379_s27, 1024, %s2381_s21, %s2383_s30, %s2196_s25, %s2196_s25, %s2197_s12  }
  0x51   : > { %p2970_p11 = scmp.ne.s32.totalorder %s2964_s22, 0 }
  0x52   : > { %s2414_s14 = sand.u32 (!%p2970_p11), 1, %s2183_s26   ;;  %p2971_p13 = scmp.ne.s32.totalorder (!%p2970_p11), %s2960_s19, 0 }
  0x53   : > { %428 = sbr.rel (%p2970_p11) target bundleno = 1606 (0x646), region = 72  ;;  %s1819_s24 = sshll.u32 (!%p2970_p11), %s2414_s14, 6 }
  0x54   : > { %s431_s17 = scalar_lea.sflag (!%p2970_p11), [#allocation5], %s2414_s14  ;;  %s2420_s18 = scalar_lea.vmem (!%p2970_p11), [#allocation4], %s1819_s24 }
  0x5a   : > { %2162 = dma.done.wait (%p2971_p13), %s431_s17, 1024  }
  0x5b   : > { %2164 = vsyncadd (%p2971_p13), %s431_s17, 4294966272  ;;  %p2972_p6 = scmp.eq.s32.totalorder %s2297_s29, 0 }
  0x5d   : > { %2166 = dma.done.wait (%p2972_p6), [#allocation7], 16   ;;  %p2973_p3 = pmov %p2972_p6 }
  0x5f   : > { %2168 = vsyncadd (%p2973_p3), [#allocation7], 4294967280  ;;  %p2974_p9 = pmov %p2973_p3 }
  0x60   : > { %p2975_p1 = pmov %p2973_p3 }
  0x61   : > { %2170 = dma.done.wait (%p2974_p9), [#allocation10], 16  }
  0x62   : > { %2172 = vsyncadd (%p2975_p1), [#allocation10], 4294967280 }
  0x63   : > { %447 = sfence }
  0x64   : > { %v2035_v0 = vld [vmem:[%s2930_s1] sm:$0xff]   ;;  %v2036_v1 = vld [vmem:[%s2930_s1 + $0x8] sm:$0xff]   ;;  %vm515_vm0 = vcmask 261120   ;;  %v489_v5 = vld [vmem:[%s2420_s18 + $0x10] sm:$0xff]  ;;  %vm635_vm1 = vcmask 523264   ;;  %vm637_vm2 = vcmask 517120  }
  0x65   : > { %1909 = vmatprep.subr.bf16.mxu0 %v2035_v0  ;;  %v487_v2 = vld [vmem:[%s2420_s18] sm:$0xff]  ;;  %v488_v3 = vld [vmem:[%s2420_s18 + $0x8] sm:$0xff]  ;;  %v490_v6 = vld [vmem:[%s2420_s18 + $0x18] sm:$0xff]  ;;  %v2198_v14 = vmov 0.0   ;;  %vm2200_vm3 = vmmov 0   ;;  %vm1218_vm4 = vcmask 1041408  }
  0x66   : > { %1910 = vmatpush3.bf16.msra.mxu0 %v2035_v0  ;;  %v495_v4 = vpack.c.bf16 %v488_v3, %v487_v2  ;;  %v491_v7 = vld [vmem:[%s2420_s18 + $0x20] sm:$0xff]  ;;  %v492_v8 = vld [vmem:[%s2420_s18 + $0x28] sm:$0xff]  ;;  %v496_v9 = vpack.c.bf16 %v490_v6, %v489_v5  ;;  %v493_v11 = vld [vmem:[%s2420_s18 + $0x30] sm:$0xff]  ;;  %643 = vst.msk [vmem:[#allocation2 + $0x30] sm:$0xff] %vm635_vm1, %v2198_v14  ;;  %vm1214_vm5 = vcmask 15360   ;;  %vm1367_vm6 = vcmask 80896  }
  0x67   : > { %1911 = vmatprep.subr.bf16.mxu0 %v2036_v1  ;;  %v497_v10 = vpack.c.bf16 %v492_v8, %v491_v7  ;;  %v494_v12 = vld [vmem:[%s2420_s18 + $0x38] sm:$0xff]  ;;  %644 = vst.msk [vmem:[#allocation2 + $0x38] sm:$0x3] %vm637_vm2, %v2198_v14  ;;  %638 = vst.msk [vmem:[#allocation2 + $0x8] sm:$0x3] %vm637_vm2, %v2198_v14  ;;  %v2037_v15 = vld [vmem:[%s2934_s5] sm:$0xff]  }
  0x68   : > { %1913 = vmatprep.mubr.msk.bf16.mxu0 %vm515_vm0, %v495_v4  ;;  %v498_v13 = vpack.c.bf16 %v494_v12, %v493_v11  ;;  %636 = vst.msk [vmem:[#allocation2] sm:$0xff] %vm635_vm1, %v2198_v14  ;;  %639 = vst.msk [vmem:[#allocation2 + $0x10] sm:$0xff] %vm635_vm1, %v2198_v14  ;;  %v2038_v16 = vld [vmem:[%s2934_s5 + $0x8] sm:$0xff]   ;;  %1921 = vmatprep.subr.bf16.mxu1 %v2037_v15  ;;  %v2039_v17 = vld [vmem:[%s2934_s5 + $0x10] sm:$0xff]   ;;  %vm1369_vm7 = vcmask 74752   ;;  %vm1416_vm8 = vcmask 1041409  }
  0x69   : > { %640 = vst.msk [vmem:[#allocation2 + $0x18] sm:$0x3] %vm637_vm2, %v2198_v14  ;;  %642 = vst.msk [vmem:[#allocation2 + $0x28] sm:$0x3] %vm637_vm2, %v2198_v14  ;;  %1922 = vmatpush3.bf16.msra.mxu1 %v2037_v15  ;;  %v2040_v18 = vld [vmem:[%s2934_s5 + $0x18] sm:$0xff]   ;;  %vm1418_vm9 = vcmask 1042434  }
  0x6a   : > { %1912 = vmatpush3.bf16.msra.mxu0 %v2036_v1  ;;  %641 = vst.msk [vmem:[#allocation2 + $0x20] sm:$0xff] %vm635_vm1, %v2198_v14  ;;  %645 = vst.msk [vmem:[#allocation2 + $0x40] sm:$0xff] %vm635_vm1, %v2198_v14  ;;  %1923 = vmatprep.subr.bf16.mxu1 %v2038_v16  ;;  %v1829_v19 = vld [vmem:[%s2931_s2] ss:$0 sm:$0xff]  ;;  %v1830_v21 = vld [vmem:[%s2931_s2 + $0x1] ss:$0 sm:$0xff] }
  0x6b   : > { %646 = vst.msk [vmem:[#allocation2 + $0x48] sm:$0x3] %vm637_vm2, %v2198_v14  ;;  %648 = vst.msk [vmem:[#allocation2 + $0x58] sm:$0x3] %vm637_vm2, %v2198_v14  ;;  %v2513_v34 = vld [vmem:[%s2932_s3] ss:$0 sm:$0xff] }
  0x6c   : > { %647 = vst.msk [vmem:[#allocation2 + $0x50] sm:$0xff] %vm635_vm1, %v2198_v14  ;;  %649 = vst.msk [vmem:[#allocation2 + $0x60] sm:$0xff] %vm635_vm1, %v2198_v14  ;;  %v2518_v36 = vld [vmem:[%s2932_s3 + $0x1] ss:$0 sm:$0xff]  ;;  %v2526_v50 = vld [vmem:[%s2932_s3 + $0x2] ss:$0 sm:$0xff] }
  0x6d   : > { %1914 = vmatmul.mubr.msk.bf16.vlgmr.msra.gmra.mrb[0].mxu0 %vm515_vm0, %v496_v9  ;;  %650 = vst.msk [vmem:[#allocation2 + $0x68] sm:$0x3] %vm637_vm2, %v2198_v14  ;;  %652 = vst.msk [vmem:[#allocation2 + $0x78] sm:$0x3] %vm637_vm2, %v2198_v14  ;;  %1924 = vmatpush3.bf16.msra.mxu1 %v2038_v16  ;;  %v2535_v63 = vld [vmem:[%s2932_s3 + $0x8] ss:$0 sm:$0xff] }
  0x6e   : > { %1917 = vmatprep.mubr.msk.bf16.mxu0 %vm515_vm0, %v497_v10  ;;  %651 = vst.msk [vmem:[#allocation2 + $0x70] sm:$0xff] %vm635_vm1, %v2198_v14  ;;  %653 = vst.msk [vmem:[#allocation2 + $0x80] sm:$0xff] %vm635_vm1, %v2198_v14  ;;  %1925 = vmatprep.subr.bf16.mxu1 %v2039_v17  ;;  %v2540_v2 = vld [vmem:[%s2932_s3 + $0x4] ss:$0 sm:$0xff]  ;;  %v2545_v3 = vld [vmem:[%s2932_s3 + $0x9] ss:$0 sm:$0xff] }
  0x6f   : > { %654 = vst.msk [vmem:[#allocation2 + $0x88] sm:$0x3] %vm637_vm2, %v2198_v14  ;;  %656 = vst.msk [vmem:[#allocation2 + $0x98] sm:$0x3] %vm637_vm2, %v2198_v14  ;;  %v666_v31 = vld [vmem:[#allocation2] sm:$0xff]  ;;  %vm1420_vm10 = vcmask 1043459  }
  0x70   : > { %655 = vst.msk [vmem:[#allocation2 + $0x90] sm:$0xff] %vm635_vm1, %v2198_v14  ;;  %v695_v35 = vld [vmem:[#allocation2 + $0x1] sm:$0xff]  ;;  %v679_v44 = vmul.f32 %v2513_v34, %v666_v31  ;;  %v2550_v4 = vld [vmem:[%s2932_s3 + $0xa] ss:$0 sm:$0xff]  ;;  %vm1422_vm11 = vcmask 1044484   ;;  %vm1424_vm12 = vcmask 1045509  }
  0x71   : > { %1926 = vmatpush3.bf16.msra.mxu1 %v2039_v17  ;;  %v708_v45 = vmul.f32 %v2518_v36, %v695_v35  ;;  %v724_v49 = vld [vmem:[#allocation2 + $0x2] sm:$0xff]  ;;  %1371 = vst.msk [vmem:[#allocation3 + $0x10] sm:$0xff] %vm1367_vm6, %v2198_v14  ;;  %1368 = vst.msk [vmem:[#allocation3] sm:$0xff] %vm1367_vm6, %v2198_v14  ;;  %vm1426_vm13 = vcmask 1046534   ;;  %vm1428_vm14 = vcmask 1047559   ;;  %vm1431_vm15 = vcmask 72712  }
  0x72   : > { %1927 = vmatprep.subr.bf16.mxu1 %v2040_v18  ;;  %v737_v60 = vmul.f32 %v2526_v50, %v724_v49  ;;  %v2555_v7 = vld [vmem:[%s2932_s3 + $0x5] ss:$0 sm:$0xff]  ;;  %v2560_v8 = vld [vmem:[%s2932_s3 + $0x6] ss:$0 sm:$0xff]  ;;  %1372 = vst.msk [vmem:[#allocation3 + $0x18] sm:$0x3] %vm1369_vm7, %v2198_v14 }
  0x73   : > { %v716_v59 = vadd.f32 %v708_v45, %v679_v44  ;;  %1370 = vst.msk [vmem:[#allocation3 + $0x8] sm:$0x3] %vm1369_vm7, %v2198_v14  ;;  %s1865_s11 = sld [smem:[#allocation8 + $0x4]]  ;;  %s1863_s25 = sld [smem:[#allocation8 + $0x2]] }
  0x74   : > { %s1484_s12 = sld [smem:[#allocation8]]  ;;  %s1862_s17 = sld [smem:[#allocation8 + $0x1]] }
  0x75   : > { %1918 = vmatmul.mubr.msk.bf16.gmra.mrb[4].mxu0 %vm515_vm0, %v498_v13  ;;  %1928 = vmatpush3.bf16.msra.mxu1 %v2040_v18  ;;  %v745_v11 = vadd.f32 %v737_v60, %v716_v59  ;;  %s1864_s27 = sld [smem:[#allocation8 + $0x3]]  ;;  %s1869_s21 = sld [smem:[#allocation8 + $0x8]] }
  0x76   : > { %1945 = vmatprep.mubr.msk.f32.mxu0 %vm2200_vm3, %v2198_v14  ;;  %s1866_s19 = sld [smem:[#allocation8 + $0x5]]  ;;  %s1871_s22 = sld [smem:[#allocation8 + $0xa]] }
  0x77   : > { %s1870_s23 = sld [smem:[#allocation8 + $0x9]]  ;;  %s1875_s30 = sld [smem:[#allocation8 + $0xe]] }
  0x78   : > { %s2201_s15 = smov 126   ;;  %s2202_s16 = smov 127  }
  0x79   : > { %p2976_p2 = scmp.ne.s32.totalorder %s2961_s20, 0 }
 0x140   : > { %v1915_v20 = vpop.f32.mrb[0].mxu0 }
 0x141   : > { %v600_v22 = vmul.f32 %v1915_v20, %v1829_v19  ;;  %v562_v23 = vpop.f32.mrb[1].mxu0 }
 0x142   : > { %v598_v24 = vmul.f32 %v1829_v19, %v562_v23  ;;  %v1916_v25 = vpop.f32.mrb[2].mxu0 }
 0x143   : > { %v613_v26 = vadd.f32 %v1830_v21, %v600_v22  ;;  %v601_v27 = vmul.f32 %v1916_v25, %v1829_v19  ;;  %v565_v28 = vpop.f32.mrb[3].mxu0 }
 0x144   : > { %v611_v29 = vadd.f32 %v1830_v21, %v598_v24  ;;  %v599_v30 = vmul.f32 %v1829_v19, %v565_v28 }
 0x145   : > { %v621_v32 = vmax.f32 %v613_v26, 0.0  ;;  %v614_v33 = vadd.f32 %v1830_v21, %v601_v27 }
 0x146   : > { %v619_v37 = vmax.f32 %v611_v29, 0.0  ;;  %v612_v38 = vadd.f32 %v1830_v21, %v599_v30 }
 0x147   : > { %v629_v39 = vmin.f32 %v621_v32, 6.0  ;;  %v622_v40 = vmax.f32 %v614_v33, 0.0 }
 0x148   : > { %v627_v41 = vmin.f32 %v619_v37, 6.0  ;;  %v620_v42 = vmax.f32 %v612_v38, 0.0  ;;  %v1919_v43 = vpop.f32.mrb[4].mxu0 }
 0x149   : > { %660 = vst.msk [vmem:[#allocation2 + $0x31] sm:$0xff] %vm635_vm1, %v629_v39  ;;  %v630_v46 = vmin.f32 %v622_v40, 6.0  ;;  %v604_v47 = vmul.f32 %v1919_v43, %v1829_v19  ;;  %v578_v48 = vpop.f32.mrb[5].mxu0 }
 0x14a   : > { %658 = vst.msk [vmem:[#allocation2 + $0x11] sm:$0xff] %vm635_vm1, %v627_v41  ;;  %v628_v51 = vmin.f32 %v620_v42, 6.0  ;;  %v602_v52 = vmul.f32 %v1829_v19, %v578_v48  ;;  %v1920_v53 = vpop.f32.mrb[6].mxu0 }
 0x14b   : > { %661 = vst.msk [vmem:[#allocation2 + $0x41] sm:$0xff] %vm635_vm1, %v630_v46  ;;  %v617_v54 = vadd.f32 %v1830_v21, %v604_v47  ;;  %v605_v55 = vmul.f32 %v1920_v53, %v1829_v19  ;;  %v581_v56 = vpop.f32.mrb[7].mxu0 }
 0x14c   : > { %659 = vst.msk [vmem:[#allocation2 + $0x21] sm:$0xff] %vm635_vm1, %v628_v51  ;;  %v615_v57 = vadd.f32 %v1830_v21, %v602_v52  ;;  %v603_v58 = vmul.f32 %v1829_v19, %v581_v56 }
 0x14d   : > { %v625_v61 = vmax.f32 %v617_v54, 0.0  ;;  %v618_v62 = vadd.f32 %v1830_v21, %v605_v55 }
 0x14e   : > { %v623_v0 = vmax.f32 %v615_v57, 0.0  ;;  %v616_v1 = vadd.f32 %v1830_v21, %v603_v58 }
 0x14f   : > { %v633_v5 = vmin.f32 %v625_v61, 6.0  ;;  %v626_v6 = vmax.f32 %v618_v62, 0.0 }
 0x150   : > { %v631_v9 = vmin.f32 %v623_v0, 6.0  ;;  %v624_v10 = vmax.f32 %v616_v1, 0.0  ;;  %v843_v12 = vld [vmem:[#allocation2 + $0x30] sm:$0xff] }
 0x151   : > { %v873_v13 = vld [vmem:[#allocation2 + $0x31] sm:$0xff]  ;;  %664 = vst.msk [vmem:[#allocation2 + $0x71] sm:$0xff] %vm635_vm1, %v633_v5  ;;  %v634_v16 = vmin.f32 %v626_v6, 6.0  ;;  %v2564_v20 = vmul.f32 %v2535_v63, %v843_v12  ;;  %v682_v33 = vmul.f32 %v2513_v34, %v843_v12  ;;  %v769_v54 = vmul.f32 %v2540_v2, %v843_v12 }
 0x152   : > { %v902_v15 = vld [vmem:[#allocation2 + $0x32] sm:$0xff]  ;;  %v2567_v21 = vmul.f32 %v2545_v3, %v873_v13  ;;  %662 = vst.msk [vmem:[#allocation2 + $0x51] sm:$0xff] %vm635_vm1, %v631_v9  ;;  %v632_v23 = vmin.f32 %v624_v10, 6.0  ;;  %v756_v44 = vld [vmem:[#allocation2 + $0x40] sm:$0xff]  ;;  %v711_v48 = vmul.f32 %v2518_v36, %v873_v13  ;;  %v798_v61 = vmul.f32 %v2555_v7, %v873_v13 }
 0x153   : > { %v667_v17 = vld [vmem:[#allocation2 + $0x10] sm:$0xff]  ;;  %v2570_v22 = vmul.f32 %v2550_v4, %v902_v15  ;;  %665 = vst.msk [vmem:[#allocation2 + $0x81] sm:$0xff] %vm635_vm1, %v634_v16  ;;  %v754_v27 = vld [vmem:[#allocation2 + $0x20] sm:$0xff]  ;;  %v740_v53 = vmul.f32 %v2526_v50, %v902_v15  ;;  %v770_v59 = vmul.f32 %v2540_v2, %v756_v44  ;;  %v827_v0 = vmul.f32 %v2560_v8, %v902_v15 }
 0x154   : > { %v696_v18 = vld [vmem:[#allocation2 + $0x11] sm:$0xff]  ;;  %v680_v24 = vmul.f32 %v2513_v34, %v667_v17  ;;  %v767_v28 = vmul.f32 %v2540_v2, %v667_v17  ;;  %v784_v29 = vld [vmem:[#allocation2 + $0x21] sm:$0xff]  ;;  %663 = vst.msk [vmem:[#allocation2 + $0x61] sm:$0xff] %vm635_vm1, %v632_v23  ;;  %v768_v37 = vmul.f32 %v2540_v2, %v754_v27  ;;  %v856_v41 = vmul.f32 %v2535_v63, %v754_v27 }
 0x155   : > { %v725_v19 = vld [vmem:[#allocation2 + $0x12] sm:$0xff]  ;;  %v709_v25 = vmul.f32 %v2518_v36, %v696_v18  ;;  %v796_v30 = vmul.f32 %v2555_v7, %v696_v18  ;;  %v813_v31 = vld [vmem:[#allocation2 + $0x22] sm:$0xff]  ;;  %v797_v38 = vmul.f32 %v2555_v7, %v784_v29  ;;  %v885_v42 = vmul.f32 %v2545_v3, %v784_v29 }
 0x156   : > { %v738_v26 = vmul.f32 %v2526_v50, %v725_v19  ;;  %v825_v32 = vmul.f32 %v2560_v8, %v725_v19  ;;  %v826_v39 = vmul.f32 %v2560_v8, %v813_v31  ;;  %v775_v40 = vadd.f32 %v767_v28, %v745_v11  ;;  %v786_v49 = vld [vmem:[#allocation2 + $0x41] sm:$0xff] }
 0x157   : > { %v717_v35 = vadd.f32 %v709_v25, %v680_v24  ;;  %v914_v43 = vmul.f32 %v2550_v4, %v813_v31  ;;  %v681_v46 = vmul.f32 %v2513_v34, %v754_v27  ;;  %v710_v47 = vmul.f32 %v2518_v36, %v784_v29  ;;  %v815_v55 = vld [vmem:[#allocation2 + $0x42] sm:$0xff] }
 0x158   : > { %v804_v51 = vadd.f32 %v796_v30, %v775_v40  ;;  %v739_v52 = vmul.f32 %v2526_v50, %v813_v31  ;;  %v719_v58 = vadd.f32 %v711_v48, %v682_v33  ;;  %v799_v62 = vmul.f32 %v2555_v7, %v786_v49  ;;  %v2610_v30 = vld [vmem:[%s2933_s4] ss:$0 sm:$0xff] }
 0x159   : > { %v746_v45 = vadd.f32 %v738_v26, %v717_v35  ;;  %v718_v57 = vadd.f32 %v710_v47, %v681_v46  ;;  %v845_v1 = vld [vmem:[#allocation2 + $0x50] sm:$0xff]  ;;  %v828_v11 = vmul.f32 %v2560_v8, %v815_v55  ;;  %v858_v17 = vmul.f32 %v2535_v63, %v756_v44 }
 0x15a   : > { %v833_v60 = vadd.f32 %v825_v32, %v804_v51  ;;  %v875_v5 = vld [vmem:[#allocation2 + $0x51] sm:$0xff]  ;;  %v748_v10 = vadd.f32 %v740_v53, %v719_v58  ;;  %v859_v18 = vmul.f32 %v2535_v63, %v845_v1  ;;  %v887_v19 = vmul.f32 %v2545_v3, %v786_v49 }
 0x15b   : > { %v776_v56 = vadd.f32 %v768_v37, %v746_v45  ;;  %v747_v9 = vadd.f32 %v739_v52, %v718_v57  ;;  %v904_v12 = vld [vmem:[#allocation2 + $0x52] sm:$0xff]  ;;  %v888_v15 = vmul.f32 %v2545_v3, %v875_v5  ;;  %v916_v26 = vmul.f32 %v2550_v4, %v815_v55  ;;  %v758_v40 = vld [vmem:[#allocation2 + $0x60] sm:$0xff] }
 0x15c   : > { %v864_v16 = vadd.f32 %v856_v41, %v833_v60  ;;  %v778_v24 = vadd.f32 %v770_v59, %v748_v10  ;;  %v917_v27 = vmul.f32 %v2550_v4, %v904_v12  ;;  %v683_v28 = vmul.f32 %v2513_v34, %v756_v44  ;;  %v817_v58 = vld [vmem:[#allocation2 + $0x62] sm:$0xff] }
 0x15d   : > { %v805_v6 = vadd.f32 %v797_v38, %v776_v56  ;;  %v777_v23 = vadd.f32 %v769_v54, %v747_v9  ;;  %v684_v33 = vmul.f32 %v2513_v34, %v845_v1  ;;  %v712_v37 = vmul.f32 %v2518_v36, %v786_v49  ;;  %v788_v49 = vld [vmem:[#allocation2 + $0x61] sm:$0xff]  ;;  %v847_v9 = vld [vmem:[#allocation2 + $0x70] sm:$0xff] }
 0x15e   : > { %v893_v25 = vadd.f32 %v885_v42, %v864_v16  ;;  %v807_v32 = vadd.f32 %v799_v62, %v778_v24  ;;  %v713_v38 = vmul.f32 %v2518_v36, %v875_v5  ;;  %v742_v45 = vmul.f32 %v2526_v50, %v904_v12 }
 0x15f   : > { %v834_v13 = vadd.f32 %v826_v39, %v805_v6  ;;  %v806_v31 = vadd.f32 %v798_v61, %v777_v23  ;;  %v741_v39 = vmul.f32 %v2526_v50, %v815_v55  ;;  %v720_v46 = vadd.f32 %v712_v37, %v683_v28  ;;  %v906_v28 = vld [vmem:[#allocation2 + $0x72] sm:$0xff] }
 0x160   : > { %v922_v35 = vadd.f32 %v914_v43, %v893_v25  ;;  %v836_v44 = vadd.f32 %v828_v11, %v807_v32  ;;  %v721_v47 = vadd.f32 %v713_v38, %v684_v33  ;;  %v771_v48 = vmul.f32 %v2540_v2, %v845_v1 }
 0x161   : > { %v865_v29 = vadd.f32 %v2564_v20, %v834_v13  ;;  %v2620_v20 = vld [vmem:[%s2933_s4 + $0x1] ss:$0 sm:$0xff]  ;;  %v835_v42 = vadd.f32 %v827_v0, %v806_v31  ;;  %v772_v53 = vmul.f32 %v2540_v2, %v758_v40  ;;  %v749_v55 = vadd.f32 %v741_v39, %v720_v46 }
 0x162   : > { %v935_v43 = vmul.f32 %v2610_v30, %v922_v35  ;;  %v750_v56 = vadd.f32 %v742_v45, %v721_v47  ;;  %v800_v57 = vmul.f32 %v2555_v7, %v875_v5  ;;  %v801_v62 = vmul.f32 %v2555_v7, %v788_v49  ;;  %v877_v5 = vld [vmem:[#allocation2 + $0x71] sm:$0xff] }
 0x163   : > { %v894_v41 = vadd.f32 %v2567_v21, %v865_v29  ;;  %v866_v52 = vadd.f32 %v858_v17, %v835_v42  ;;  %v867_v21 = vadd.f32 %v859_v18, %v836_v44  ;;  %v779_v1 = vadd.f32 %v771_v48, %v749_v55 }
 0x164   : > { %v948_v54 = vadd.f32 %v2620_v20, %v935_v43  ;;  %v829_v6 = vmul.f32 %v2560_v8, %v904_v12  ;;  %v830_v17 = vmul.f32 %v2560_v8, %v817_v58  ;;  %v861_v12 = vmul.f32 %v2535_v63, %v847_v9 }
 0x165   : > { %v923_v51 = vadd.f32 %v2570_v22, %v894_v41  ;;  %v895_v60 = vadd.f32 %v887_v19, %v866_v52  ;;  %v896_v61 = vadd.f32 %v888_v15, %v867_v21  ;;  %v780_v22 = vadd.f32 %v772_v53, %v750_v56  ;;  %v760_v21 = vld [vmem:[#allocation2 + $0x80] sm:$0xff] }
 0x166   : > { %v956_v0 = vmax.f32 %v948_v54, 0.0  ;;  %v808_v13 = vadd.f32 %v800_v57, %v779_v1  ;;  %v860_v19 = vmul.f32 %v2535_v63, %v758_v40  ;;  %v918_v37 = vmul.f32 %v2550_v4, %v817_v58 }
 0x167   : > { %v936_v59 = vmul.f32 %v2610_v30, %v923_v51  ;;  %v924_v11 = vadd.f32 %v916_v26, %v895_v60  ;;  %v925_v16 = vadd.f32 %v917_v27, %v896_v61  ;;  %v809_v23 = vadd.f32 %v801_v62, %v780_v22 }
 0x168   : > { %v964_v18 = vmin.f32 %v956_v0, 6.0  ;;  %v837_v29 = vadd.f32 %v829_v6, %v808_v13  ;;  %v889_v26 = vmul.f32 %v2545_v3, %v788_v49  ;;  %v890_v27 = vmul.f32 %v2545_v3, %v877_v5  ;;  %v819_v6 = vld [vmem:[#allocation2 + $0x82] sm:$0xff] }
 0x169   : > { %v949_v10 = vadd.f32 %v2620_v20, %v936_v59  ;;  %v937_v15 = vmul.f32 %v2610_v30, %v924_v11  ;;  %v938_v25 = vmul.f32 %v2610_v30, %v925_v16  ;;  %v838_v31 = vadd.f32 %v830_v17, %v809_v23  ;;  %v879_v17 = vld [vmem:[#allocation2 + $0x91] sm:$0xff] }
 0x16a   : > { %v868_v38 = vadd.f32 %v860_v19, %v837_v29  ;;  %v919_v41 = vmul.f32 %v2550_v4, %v906_v28  ;;  %v685_v42 = vmul.f32 %v2513_v34, %v758_v40  ;;  %v686_v46 = vmul.f32 %v2513_v34, %v847_v9  ;;  %v790_v34 = vld [vmem:[#allocation2 + $0x81] sm:$0xff] }
 0x16b   : > { %v957_v24 = vmax.f32 %v949_v10, 0.0  ;;  %v950_v33 = vadd.f32 %v2620_v20, %v937_v15  ;;  %v951_v35 = vadd.f32 %v2620_v20, %v938_v25  ;;  %v869_v39 = vadd.f32 %v861_v12, %v838_v31 }
 0x16c   : > { %v897_v47 = vadd.f32 %v889_v26, %v868_v38  ;;  %v714_v51 = vmul.f32 %v2518_v36, %v788_v49  ;;  %v715_v52 = vmul.f32 %v2518_v36, %v877_v5  ;;  %v743_v55 = vmul.f32 %v2526_v50, %v817_v58  ;;  %v849_v58 = vld [vmem:[#allocation2 + $0x90] sm:$0xff] }
 0x16d   : > { %v965_v32 = vmin.f32 %v957_v24, 6.0  ;;  %v958_v45 = vmax.f32 %v950_v33, 0.0  ;;  %v959_v43 = vmax.f32 %v951_v35, 0.0  ;;  %v898_v48 = vadd.f32 %v890_v27, %v869_v39 }
 0x16e   : > { %v744_v40 = vmul.f32 %v2526_v50, %v906_v28  ;;  %v926_v56 = vadd.f32 %v918_v37, %v897_v47  ;;  %v722_v59 = vadd.f32 %v714_v51, %v685_v42  ;;  %v723_v60 = vadd.f32 %v715_v52, %v686_v46  ;;  %v1134_v52 = vld [vmem:[%s2936_s7 + $0x8] sm:$0xff] }
 0x16f   : > { %v972_v44 = vpack.c.bf16 %v965_v32, %v964_v18  ;;  %v966_v53 = vmin.f32 %v958_v45, 6.0  ;;  %v967_v54 = vmin.f32 %v959_v43, 6.0  ;;  %v927_v57 = vadd.f32 %v919_v41, %v898_v48 }
 0x170   : > { %v773_v62 = vmul.f32 %v2540_v2, %v847_v9  ;;  %v774_v49 = vmul.f32 %v2540_v2, %v760_v21  ;;  %v939_v36 = vmul.f32 %v2610_v30, %v926_v56  ;;  %v751_v1 = vadd.f32 %v743_v55, %v722_v59  ;;  %v1856_v59 = vld [vmem:[%s2935_s6] ss:$0 sm:$0xff] }
 0x171   : > { %1929 = vmatprep.mubr.msk.bf16.mxu1 %vm635_vm1, %v972_v44  ;;  %v973_v61 = vpack.c.bf16 %v967_v54, %v966_v53  ;;  %v940_v0 = vmul.f32 %v2610_v30, %v927_v57  ;;  %v752_v22 = vadd.f32 %v744_v40, %v723_v60  ;;  %v802_v50 = vmul.f32 %v2555_v7, %v877_v5  ;;  %v908_v5 = vld [vmem:[#allocation2 + $0x92] sm:$0xff] }
 0x172   : > { %v803_v10 = vmul.f32 %v2555_v7, %v790_v34  ;;  %v952_v11 = vadd.f32 %v2620_v20, %v939_v36  ;;  %v781_v16 = vadd.f32 %v773_v62, %v751_v1  ;;  %v831_v18 = vmul.f32 %v2560_v8, %v906_v28  ;;  %v1136_v53 = vld [vmem:[%s2936_s7 + $0x18] sm:$0xff] }
 0x173   : > { %1930 = vmatmul.mubr.msk.bf16.vlgmr.msra.gmra.mrb[0].mxu1 %vm635_vm1, %v973_v61  ;;  %v953_v9 = vadd.f32 %v2620_v20, %v940_v0  ;;  %v782_v2 = vadd.f32 %v774_v49, %v752_v22  ;;  %v832_v13 = vmul.f32 %v2560_v8, %v819_v6  ;;  %v863_v23 = vmul.f32 %v2535_v63, %v849_v58  ;;  %v1857_v61 = vld [vmem:[%s2935_s6 + $0x1] ss:$0 sm:$0xff] }
 0x174   : > { %v960_v19 = vmax.f32 %v952_v11, 0.0  ;;  %v810_v15 = vadd.f32 %v802_v50, %v781_v16  ;;  %v862_v7 = vmul.f32 %v2535_v63, %v760_v21  ;;  %v892_v12 = vmul.f32 %v2545_v3, %v879_v17 }
 0x175   : > { %v961_v24 = vmax.f32 %v953_v9, 0.0  ;;  %v811_v25 = vadd.f32 %v803_v10, %v782_v2  ;;  %v921_v32 = vmul.f32 %v2550_v4, %v908_v5  ;;  %v891_v35 = vmul.f32 %v2545_v3, %v790_v34 }
 0x176   : > { %v968_v29 = vmin.f32 %v960_v19, 6.0  ;;  %v839_v26 = vadd.f32 %v831_v18, %v810_v15  ;;  %v920_v39 = vmul.f32 %v2550_v4, %v819_v6  ;;  %v1133_v4 = vld [vmem:[%s2936_s7] sm:$0xff] }
 0x177   : > { %v969_v31 = vmin.f32 %v961_v24, 6.0  ;;  %v840_v27 = vadd.f32 %v832_v13, %v811_v25  ;;  %v1954_v21 = vpack.c.bf16 %v1134_v52, %v1133_v4 }
 0x178   : > { %v870_v33 = vadd.f32 %v862_v7, %v839_v26 }
 0x179   : > { %v974_v28 = vpack.c.bf16 %v969_v31, %v968_v29  ;;  %v871_v8 = vadd.f32 %v863_v23, %v840_v27 }
 0x17a   : > { %v899_v37 = vadd.f32 %v891_v35, %v870_v33 }
 0x17b   : > { %1933 = vmatprep.mubr.msk.bf16.mxu1 %vm635_vm1, %v974_v28  ;;  %v900_v38 = vadd.f32 %v892_v12, %v871_v8 }
 0x17c   : > { %v928_v63 = vadd.f32 %v920_v39, %v899_v37 }
 0x17d   : > { %v929_v41 = vadd.f32 %v921_v32, %v900_v38 }
 0x17e   : > { %v941_v42 = vmul.f32 %v2610_v30, %v928_v63 }
 0x17f   : > { %v942_v44 = vmul.f32 %v2610_v30, %v929_v41  ;;  %v1135_v30 = vld [vmem:[%s2936_s7 + $0x10] sm:$0xff] }
 0x180   : > { %v954_v45 = vadd.f32 %v2620_v20, %v941_v42  ;;  %v1957_v54 = vpack.c.bf16 %v1136_v53, %v1135_v30 }
 0x181   : > { %v955_v43 = vadd.f32 %v2620_v20, %v942_v44  ;;  %v2199_v20 = vmov 0.0|0.0   ;;  %v1212_v44 = vld [vmem:[%s2938_s9] sm:$0x3] }
 0x182   : > { %v962_v46 = vmax.f32 %v954_v45, 0.0  ;;  %1953 = vmatprep.subr.bf16.mxu0 %v2199_v20  ;;  %v1137_v45 = vld [vmem:[%s2937_s8] sm:$0x1] }
 0x183   : > { %v963_v47 = vmax.f32 %v955_v43, 0.0  ;;  %1955 = vmatpush3.bf16.msra.mxu0 %v1954_v21 }
 0x184   : > { %v970_v48 = vmin.f32 %v962_v46, 6.0  ;;  %1956 = vmatprep.subr.bf16.mxu0 %v2199_v20 }
 0x185   : > { %v971_v3 = vmin.f32 %v963_v47, 6.0 }
 0x187   : > { %v975_v51 = vpack.c.bf16 %v971_v3, %v970_v48  ;;  %1958 = vmatpush3.bf16.msra.mxu0 %v1957_v54  ;;  %v1213_v3 = vld [vmem:[%s2939_s10] sm:$0x1]  ;;  %v1299_v54 = vlaneseq }
 0x188   : > { %1948 = vmatprep.subr.mxu0 %v2198_v14 }
 0x189   : > { %1934 = vmatmul.mubr.msk.bf16.gmra.mrb[4].mxu1 %vm635_vm1, %v975_v51 }
 0x246   : > { %v1931_v55 = vpop.f32.mrb[0].mxu1 }
 0x247   : > { %v1054_v40 = vpop.f32.mrb[1].mxu1  ;;  %v1092_v49 = vmul.f32 %v1931_v55, %v1856_v59  ;;  %v2739_v55 = vshrl.u32 %v1299_v54, 7 }
 0x248   : > { %v1932_v56 = vpop.f32.mrb[2].mxu1  ;;  %v1090_v34 = vmul.f32 %v1856_v59, %v1054_v40 }
 0x249   : > { %v1057_v57 = vpop.f32.mrb[3].mxu1  ;;  %v2701_v1 = vadd.f32 %v1857_v61, %v1092_v49  ;;  %v1093_v6 = vmul.f32 %v1932_v56, %v1856_v59  ;;  %v1301_v40 = vsub.s32 0, %v2739_v55 }
 0x24a   : > { %v1091_v60 = vmul.f32 %v1856_v59, %v1057_v57  ;;  %v2697_v36 = vadd.f32 %v1857_v61, %v1090_v34 }
 0x24b   : > { %v1114_v50 = vsel %vm515_vm0, %v2701_v1, 0.0  ;;  %v2707_v10 = vadd.f32 %v1857_v61, %v1093_v6 }
 0x24c   : > { %v2695_v62 = vadd.f32 %v1857_v61, %v1091_v60  ;;  %v1111_v22 = vsel %vm515_vm0, %v2697_v36, 0.0 }
 0x24d   : > { %v1116_v2 = vsel %vm515_vm0, %v2707_v10, 0.0 }
 0x24e   : > { %v1112_v0 = vsel %vm515_vm0, %v2695_v62, 0.0 }
 0x24f   : > { %v1113_v58 = vadd.f32 %v1112_v0, %v1111_v22 }
 0x251   : > { %v1115_v11 = vadd.f32 %v1114_v50, %v1113_v58 }
 0x253   : > { %v1117_v23 = vadd.f32 %v1116_v2, %v1115_v11 }
 0x25c   : > { %v1935_v9 = vpop.f32.mrb[4].mxu1 }
 0x25d   : > { %v1070_v16 = vpop.f32.mrb[5].mxu1  ;;  %v1096_v17 = vmul.f32 %v1935_v9, %v1856_v59 }
 0x25e   : > { %v1094_v18 = vmul.f32 %v1856_v59, %v1070_v16  ;;  %v1936_v13 = vpop.f32.mrb[6].mxu1 }
 0x25f   : > { %v1073_v19 = vpop.f32.mrb[7].mxu1  ;;  %v1097_v15 = vmul.f32 %v1936_v13, %v1856_v59  ;;  %v2713_v5 = vadd.f32 %v1857_v61, %v1096_v17 }
 0x260   : > { %v2711_v24 = vadd.f32 %v1857_v61, %v1094_v18  ;;  %v1095_v25 = vmul.f32 %v1856_v59, %v1073_v19 }
 0x261   : > { %v2719_v31 = vadd.f32 %v1857_v61, %v1097_v15  ;;  %v1122_v32 = vsel %vm515_vm0, %v2713_v5, 0.0 }
 0x262   : > { %v1118_v7 = vsel %vm515_vm0, %v2711_v24, 0.0  ;;  %v2717_v12 = vadd.f32 %v1857_v61, %v1095_v25 }
 0x263   : > { %v1119_v29 = vadd.f32 %v1118_v7, %v1117_v23  ;;  %v1124_v33 = vsel %vm515_vm0, %v2719_v31, 0.0 }
 0x264   : > { %v1120_v26 = vsel %vm515_vm0, %v2717_v12, 0.0 }
 0x265   : > { %v1121_v27 = vadd.f32 %v1120_v26, %v1119_v29 }
 0x267   : > { %v1123_v28 = vadd.f32 %v1122_v32, %v1121_v27 }
 0x269   : > { %v1125_v8 = vadd.f32 %v1124_v33, %v1123_v28 }
 0x26b   : > { %v1126_v35 = vrot.slane %v1125_v8, 4 }
 0x26d   : > { %v1127_v37 = vadd.f32 %v1126_v35, %v1125_v8 }
 0x26f   : > { %v1128_v38 = vrot.slane %v1127_v37, 2 }
 0x271   : > { %v1129_v39 = vadd.f32 %v1128_v38, %v1127_v37 }
 0x273   : > { %v1130_v63 = vrot.slane %v1129_v39, 1 }
 0x275   : > { %v1131_v41 = vadd.f32 %v1130_v63, %v1129_v39 }
 0x277   : > { %v1132_v42 = vmul.f32 0.015625, %v1131_v41 }
 0x279   : > { %1946 = vmatmul.mubr.msk.f32.vlgmr.msra.gmra.mrb[8].mxu0 %vm515_vm0, %v1132_v42 }
 0x27a   : > { %1950 = vmatprep.mubr.msk.f32.mxu0 %vm2200_vm3, %v2198_v14  ;;  %1949 = vmatpush3.msk.msra.mxu0 %vm1218_vm4, %v1212_v44 }
 0x34c   : > { %v1207_v43 = vpop.f32.mrb[8].mxu0 }
 0x34d   : > { %v1208_v46 = vadd.f32 %v1207_v43, %v1137_v45  ;;  %v1947_v47 = vpop.f32.mrb[9].mxu0 }
 0x34f   : > { %v1211_v48 = vmax.f32 %v1208_v46, 0.0 }
 0x351   : > { %1951 = vmatmul.mubr.msk.f32.vlgmr.msra.gmra.mrb[10].mxu0 %vm1214_vm5, %v1211_v48 }
 0x424   : > { %v1288_v51 = vpop.f32.mrb[10].mxu0 }
 0x425   : > { %v1289_v4 = vadd.f32 %v1288_v51, %v1213_v3  ;;  %v1952_v52 = vpop.f32.mrb[11].mxu0 }
 0x427   : > { %v1861_v30 = vmul.f32 -2.0, %v1289_v4 }
 0x429   : > { %v1294_v20 = vmul.f32 1.442695, %v1861_v30 }
 0x42b   : > { %2041 = vpow2.f32 %v1294_v20 }
 0x435   : > { %v2042_v21 = vpop.eup %2041 }
 0x436   : > { %v1296_v53 = vadd.f32 1.0, %v2042_v21 }
 0x438   : > { %2043 = vrcp.f32 %v1296_v53 }
 0x442   : > { %v2044_v56 = vpop.eup %2043 }
 0x443   : > { %v1302_v57 = vrot.slane %v2044_v56, %v1301_v40 }
 0x445   : > { %v2745_v59 = vmul.f32 %v1302_v57, %v2697_v36  ;;  %v2752_v61 = vmul.f32 %v1302_v57, %v2695_v62  ;;  %v2759_v36 = vmul.f32 %v1302_v57, %v2701_v1  ;;  %v2766_v6 = vmul.f32 %v1302_v57, %v2707_v10 }
 0x446   : > { %v2773_v50 = vmul.f32 %v1302_v57, %v2711_v24  ;;  %v2780_v9 = vmul.f32 %v1302_v57, %v2717_v12  ;;  %v2787_v17 = vmul.f32 %v1302_v57, %v2713_v5  ;;  %v2794_v23 = vmul.f32 %v1302_v57, %v2719_v31 }
 0x447   : > { %v1335_v60 = vsel %vm515_vm0, %v2745_v59, 0.0  ;;  %v1311_v34 = vsel %vm515_vm0, %v2745_v59, -inf  ;;  %v1338_v49 = vsel %vm515_vm0, %v2752_v61, 0.0  ;;  %v1314_v0 = vsel %vm515_vm0, %v2752_v61, -inf }
 0x448   : > { %1336 = vadd.xlane.f32.xlu1 %v1335_v60  ;;  %1312 = vmax.xlane.f32.xlu0 %v1311_v34  ;;  %v1341_v22 = vsel %vm515_vm0, %v2759_v36, 0.0  ;;  %v1317_v62 = vsel %vm515_vm0, %v2759_v36, -inf  ;;  %v1344_v58 = vsel %vm515_vm0, %v2766_v6, 0.0  ;;  %v1320_v1 = vsel %vm515_vm0, %v2766_v6, -inf }
 0x449   : > { %v1347_v11 = vsel %vm515_vm0, %v2773_v50, 0.0  ;;  %v1323_v10 = vsel %vm515_vm0, %v2773_v50, -inf  ;;  %v1350_v16 = vsel %vm515_vm0, %v2780_v9, 0.0  ;;  %v1326_v2 = vsel %vm515_vm0, %v2780_v9, -inf }
 0x44a   : > { %v1353_v18 = vsel %vm515_vm0, %v2787_v17, 0.0  ;;  %v1329_v13 = vsel %vm515_vm0, %v2787_v17, -inf  ;;  %v1356_v19 = vsel %vm515_vm0, %v2794_v23, 0.0  ;;  %v1332_v24 = vsel %vm515_vm0, %v2794_v23, -inf }
 0x44b   : > { %v1382_v31 = vand.u32 127, %v1299_v54 }
 0x44c   : > { %1339 = vadd.xlane.f32.xlu1 %v1338_v49  ;;  %1315 = vmax.xlane.f32.xlu0 %v1314_v0 }
 0x44d   : > { %v1383_v32 = vadd.s32 4294967295, %v1382_v31 }
 0x44f   : > { %v1386_v8 = vsub.s32 %v1383_v32, %v2739_v55  ;;  %v1490_v32 = vstv %s1862_s17  ;;  %s1878_s17 = sld [smem:[#allocation8 + $0x11]] }
 0x450   : > { %1342 = vadd.xlane.f32.xlu1 %v1341_v22  ;;  %1318 = vmax.xlane.f32.xlu0 %v1317_v62 }
 0x454   : > { %1345 = vadd.xlane.f32.xlu1 %v1344_v58  ;;  %1321 = vmax.xlane.f32.xlu0 %v1320_v1 }
 0x458   : > { %1348 = vadd.xlane.f32.xlu1 %v1347_v11  ;;  %1324 = vmax.xlane.f32.xlu0 %v1323_v10 }
 0x45c   : > { %1351 = vadd.xlane.f32.xlu1 %v1350_v16  ;;  %1327 = vmax.xlane.f32.xlu0 %v1326_v2 }
 0x460   : > { %1354 = vadd.xlane.f32.xlu1 %v1353_v18  ;;  %1330 = vmax.xlane.f32.xlu0 %v1329_v13 }
 0x464   : > { %1357 = vadd.xlane.f32.xlu1 %v1356_v19  ;;  %1333 = vmax.xlane.f32.xlu0 %v1332_v24 }
 0x4d5   : > { %v1337_v15 = vpop.xlane.xlu1 %1336  ;;  %v1313_v25 = vpop.xlane.xlu0 %1312 }
 0x4d6   : > { %v1359_v37 = vmul.f32 0.03125, %v1337_v15  ;;  %v1387_v45 = vrot.slane %v1313_v25, %v1386_v8 }
 0x4d8   : > { %v1444_v48 = vrot.slane %v1359_v37, %v1386_v8 }
 0x4d9   : > { %v1340_v5 = vpop.xlane.xlu1 %1339  ;;  %v1316_v7 = vpop.xlane.xlu0 %1315 }
 0x4da   : > { %v1360_v35 = vmul.f32 0.03125, %v1340_v5  ;;  %v1391_v14 = vrot.slane %v1316_v7, %v1386_v8  ;;  %v1510_v7 = vstv %s1865_s11  ;;  %s1872_s11 = sld [smem:[#allocation8 + $0xb]] }
 0x4dc   : > { %v1448_v43 = vrot.slane %v1360_v35, %v1386_v8  ;;  %v1417_v30 = vsel %vm1416_vm8, %v1391_v14, %v1387_v45  ;;  %v1536_v35 = vstv %s1869_s21  ;;  %v1518_v14 = vstv %s1866_s19  ;;  %s1868_s21 = sld [smem:[#allocation8 + $0x7]]  ;;  %s1873_s19 = sld [smem:[#allocation8 + $0xc]] }
 0x4dd   : > { %v1343_v12 = vpop.xlane.xlu1 %1342  ;;  %v1319_v29 = vpop.xlane.xlu0 %1318 }
 0x4de   : > { %v1361_v38 = vmul.f32 0.03125, %v1343_v12  ;;  %v1395_v42 = vrot.slane %v1319_v29, %v1386_v8  ;;  %v1473_v60 = vsel %vm1416_vm8, %v1448_v43, %v1444_v48  ;;  %v1494_v12 = vstv %s1863_s25  ;;  %s1877_s25 = sld [smem:[#allocation8 + $0x10]] }
 0x4df   : > { %v1578_v48 = vstv %s1875_s30  ;;  %s1879_s30 = sld [smem:[#allocation9 + $0x1]] }
 0x4e0   : > { %v1452_v3 = vrot.slane %v1361_v38, %v1386_v8  ;;  %v1419_v54 = vsel %vm1418_vm9, %v1395_v42, %v1417_v30 }
 0x4e1   : > { %v1346_v26 = vpop.xlane.xlu1 %1345  ;;  %v1322_v27 = vpop.xlane.xlu0 %1321 }
 0x4e2   : > { %v1362_v41 = vmul.f32 0.03125, %v1346_v26  ;;  %v1399_v46 = vrot.slane %v1322_v27, %v1386_v8  ;;  %v1474_v0 = vsel %vm1418_vm9, %v1452_v3, %v1473_v60  ;;  %v1485_v27 = vstv %s1484_s12  ;;  %s1876_s12 = sld [smem:[#allocation8 + $0xf]] }
 0x4e4   : > { %v1456_v20 = vrot.slane %v1362_v41, %v1386_v8  ;;  %v1421_v34 = vsel %vm1420_vm10, %v1399_v46, %v1419_v54  ;;  %v1552_v41 = vstv %s1871_s22  ;;  %v1544_v46 = vstv %s1870_s23  ;;  %s1874_s22 = sld [smem:[#allocation8 + $0xd]]  ;;  %s1609_s23 = sld [smem:[#allocation9]] }
 0x4e5   : > { %v1349_v28 = vpop.xlane.xlu1 %1348  ;;  %v1325_v33 = vpop.xlane.xlu0 %1324 }
 0x4e6   : > { %v1363_v44 = vmul.f32 0.03125, %v1349_v28  ;;  %v1403_v51 = vrot.slane %v1325_v33, %v1386_v8  ;;  %v1475_v11 = vsel %vm1420_vm10, %v1456_v20, %v1474_v0  ;;  %v1502_v33 = vstv %s1864_s27  ;;  %s1867_s27 = sld [smem:[#allocation8 + $0x6]] }
 0x4e8   : > { %v1460_v56 = vrot.slane %v1363_v44, %v1386_v8  ;;  %v1423_v22 = vsel %vm1422_vm11, %v1403_v51, %v1421_v34 }
 0x4e9   : > { %v1352_v39 = vpop.xlane.xlu1 %1351  ;;  %v1328_v63 = vpop.xlane.xlu0 %1327 }
 0x4ea   : > { %v1364_v47 = vmul.f32 0.03125, %v1352_v39  ;;  %v1407_v21 = vrot.slane %v1328_v63, %v1386_v8  ;;  %v1476_v18 = vsel %vm1422_vm11, %v1460_v56, %v1475_v11  ;;  %v1602_v56 = vstv %s1878_s17 }
 0x4eb   : > { %v1532_v11 = vstv %s1868_s21 }
 0x4ec   : > { %v1464_v49 = vrot.slane %v1364_v47, %v1386_v8  ;;  %v1425_v10 = vsel %vm1424_vm12, %v1407_v21, %v1423_v22 }
 0x4ed   : > { %v1355_v4 = vpop.xlane.xlu1 %1354  ;;  %v1331_v52 = vpop.xlane.xlu0 %1330 }
 0x4ee   : > { %v1365_v53 = vmul.f32 0.03125, %v1355_v4  ;;  %v1411_v57 = vrot.slane %v1331_v52, %v1386_v8  ;;  %v1477_v19 = vsel %vm1424_vm12, %v1464_v49, %v1476_v18  ;;  %v1560_v4 = vstv %s1872_s11 }
 0x4ef   : > { %v1594_v52 = vstv %s1877_s25 }
 0x4f0   : > { %v1468_v62 = vrot.slane %v1365_v53, %v1386_v8  ;;  %v1427_v13 = vsel %vm1426_vm13, %v1411_v57, %v1425_v10  ;;  %v1586_v53 = vstv %s1876_s12 }
 0x4f1   : > { %v1358_v58 = vpop.xlane.xlu1 %1357  ;;  %v1334_v1 = vpop.xlane.xlu0 %1333 }
 0x4f2   : > { %v1366_v16 = vmul.f32 0.03125, %v1358_v58  ;;  %v1415_v2 = vrot.slane %v1334_v1, %v1386_v8  ;;  %v1478_v25 = vsel %vm1426_vm13, %v1468_v62, %v1477_v19  ;;  %v1527_v62 = vstv %s1867_s27  ;;  %s2203_s27 = smov [#allocation11]  }
 0x4f3   : > { %s2121_s21 = sshll.u32 %s2203_s27, 4  ;;  %s2122_s21 = int_to_ptr.vmem [resolvable:$false] %s2121_s21 }
 0x4f4   : > { %v1472_v24 = vrot.slane %v1366_v16, %v1386_v8  ;;  %v1429_v15 = vsel %vm1428_vm14, %v1415_v2, %v1427_v13 }
 0x4f5   : > { %1432 = vst.msk [vmem:[#allocation3 + $0x1] sm:$0xff] %vm1431_vm15, %v1429_v15 }
 0x4f6   : > { %v1479_v5 = vsel %vm1428_vm14, %v1472_v24, %v1478_v25 }
 0x4f7   : > { %1482 = vst.msk [vmem:[#allocation3 + $0x11] sm:$0xff] %vm1431_vm15, %v1479_v5 }
 0x4fc   : > { %v1483_v29 = vld [vmem:[#allocation3] sm:$0xff] }
 0x4fd   : > { %v1511_v31 = vmul.f32 %v1510_v7, %v1483_v29  ;;  %v1495_v26 = vmul.f32 %v1494_v12, %v1483_v29  ;;  %v1525_v8 = vld [vmem:[#allocation3 + $0x1] sm:$0xff]  ;;  %v1486_v38 = vmul.f32 %v1485_v27, %v1483_v29  ;;  %v1569_v7 = vstv %s1873_s19  ;;  %s2123_s19 = scalar_lea.vmem %s2122_s21, 2048 }
 0x4fe   : > { %v1488_v28 = vld [vmem:[#allocation3 + $0x10] sm:$0xff]  ;;  %v1537_v63 = vmul.f32 %v1536_v35, %v1525_v8  ;;  %v1553_v45 = vmul.f32 %v1552_v41, %v1525_v8  ;;  %v1567_v47 = vld [vmem:[#allocation3 + $0x2] sm:$0xff]  ;;  %v1528_v10 = vmul.f32 %v1527_v62, %v1525_v8 }
 0x4ff   : > { %1513 = vrot.lane.b32.xlu1 %v1511_v31, %s2201_s15  ;;  %1497 = vrot.lane.b32.xlu0 %v1495_v26, %s2202_s16  ;;  %v1491_v37 = vmul.f32 %v1490_v32, %v1488_v28  ;;  %v1503_v39 = vmul.f32 %v1502_v33, %v1488_v28  ;;  %v1519_v44 = vmul.f32 %v1518_v14, %v1488_v28  ;;  %v1530_v43 = vld [vmem:[#allocation3 + $0x11] sm:$0xff]  ;;  %v1574_v31 = vstv %s1874_s22 }
 0x500   : > { %v1545_v3 = vmul.f32 %v1544_v46, %v1530_v43  ;;  %v1579_v51 = vmul.f32 %v1578_v48, %v1567_v47  ;;  %v1561_v30 = vmul.f32 %v1560_v4, %v1530_v43  ;;  %v1595_v20 = vmul.f32 %v1594_v52, %v1567_v47  ;;  %v1572_v21 = vld [vmem:[#allocation3 + $0x12] sm:$0xff] }
 0x501   : > { %v1492_v42 = vadd.f32 %v1491_v37, %v1486_v38  ;;  %v1587_v54 = vmul.f32 %v1586_v53, %v1572_v21  ;;  %v1603_v57 = vmul.f32 %v1602_v56, %v1572_v21  ;;  %v1533_v18 = vmul.f32 %v1532_v11, %v1530_v43  ;;  %v2049_v11 = vld [vmem:[%s2420_s18 + $0x8] sm:$0xff] }
 0x502   : > { %v1570_v26 = vmul.f32 %v1569_v7, %v1567_v47  ;;  %v1575_v28 = vmul.f32 %v1574_v31, %v1572_v21  ;;  %v1610_v14 = vstv %s1609_s23  ;;  %v1651_v56 = vsub.s32 4, %v2739_v55 }
 0x503   : > { %1505 = vrot.lane.b32.xlu1 %v1503_v39, %s2202_s16  ;;  %1539 = vrot.lane.b32.xlu0 %v1537_v63, %s2202_s16 }
 0x507   : > { %1521 = vrot.lane.b32.xlu1 %v1519_v44, %s2201_s15  ;;  %1555 = vrot.lane.b32.xlu0 %v1553_v45, %s2201_s15  ;;  %v1613_v44 = vstv %s1879_s30 }
 0x50b   : > { %1547 = vrot.lane.b32.xlu1 %v1545_v3, %s2202_s16  ;;  %1581 = vrot.lane.b32.xlu0 %v1579_v51, %s2202_s16  ;;  %v1630_v3 = vsub.s32 1, %v2739_v55 }
 0x50f   : > { %1563 = vrot.lane.b32.xlu1 %v1561_v30, %s2201_s15  ;;  %1597 = vrot.lane.b32.xlu0 %v1595_v20, %s2201_s15  ;;  %v1644_v30 = vsub.s32 3, %v2739_v55  ;;  %v1637_v20 = vsub.s32 2, %v2739_v55 }
 0x513   : > { %1589 = vrot.lane.b32.xlu1 %v1587_v54, %s2202_s16  ;;  %v1658_v54 = vsub.s32 5, %v2739_v55 }
 0x517   : > { %1605 = vrot.lane.b32.xlu1 %v1603_v57, %s2201_s15  ;;  %s2848_s15 = scalar_lea.vmem [#allocation11], %s1819_s24  ;;  %s1887_s24 = sshll.u32 %s2297_s29, 10 }
 0x518   : > { %s1715_s16 = sshll.u32 %s2848_s15, 4  ;;  %s2877_s12 = scalar_lea.hbm %s2942_s13, %s1887_s24  ;;  %s2879_s16 = int_to_ptr.vmem [resolvable:$true] %s1715_s16 }
 0x519   : > { %s1702_s29 = scalar_lea.sflag [#allocation6], %s2414_s14  ;;  %s2117_s17 = scalar_lea.vmem %s2879_s16, 1024 }
 0x51a   : > { %p2118_p5 = scmp.ne.s32.totalorder %s2879_s16, %s2117_s17  ;;  %p2124_p4 = scmp.lt.s32.totalorder %s2879_s16, %s2122_s21 }
 0x51b   : > { %p2125_p12 = scmp.lt.s32.totalorder %s2123_s19, %s2117_s17 }
 0x51c   : > { %p2119_p8 = pnand %p2118_p5, %p2976_p2 }
 0x51d   : > { %p2126_p0 = por %p2125_p12, %p2124_p4 }
 0x51e   : > { %p2120_p10 = pneg %p2119_p8 }
 0x520   : > { %p2127_p7 = pnand %p2126_p0, %p2120_p10 }
 0x571   : > { %v1514_v60 = vpop.permute.xlu1 %1513  ;;  %v1498_v34 = vpop.permute.xlu0 %1497 }
 0x572   : > { %v1500_v49 = vadd.f32 %v1498_v34, %v1492_v42  ;;  %v1665_v34 = vsub.s32 6, %v2739_v55 }
 0x575   : > { %v1506_v0 = vpop.permute.xlu1 %1505  ;;  %v1540_v13 = vpop.permute.xlu0 %1539 }
 0x576   : > { %v1508_v22 = vadd.f32 %v1506_v0, %v1500_v49 }
 0x578   : > { %v1516_v58 = vadd.f32 %v1514_v60, %v1508_v22 }
 0x579   : > { %v1522_v1 = vpop.permute.xlu1 %1521  ;;  %v1556_v5 = vpop.permute.xlu0 %1555 }
 0x57a   : > { %v1524_v16 = vadd.f32 %v1522_v1, %v1516_v58 }
 0x57c   : > { %v1529_v2 = vadd.f32 %v1528_v10, %v1524_v16  ;;  %v2050_v16 = vld [vmem:[%s2420_s18] sm:$0xff] }
 0x57d   : > { %v1548_v24 = vpop.permute.xlu1 %1547  ;;  %v1582_v33 = vpop.permute.xlu0 %1581 }
 0x57e   : > { %v1534_v19 = vadd.f32 %v1533_v18, %v1529_v2 }
 0x580   : > { %v1542_v15 = vadd.f32 %v1540_v13, %v1534_v19  ;;  %v2051_v13 = vld [vmem:[%s2420_s18 + $0x18] sm:$0xff] }
 0x581   : > { %v1564_v29 = vpop.permute.xlu1 %1563  ;;  %v1598_v39 = vpop.permute.xlu0 %1597 }
 0x582   : > { %v1550_v25 = vadd.f32 %v1548_v24, %v1542_v15  ;;  %v2052_v24 = vld [vmem:[%s2420_s18 + $0x10] sm:$0xff] }
 0x584   : > { %v1558_v12 = vadd.f32 %v1556_v5, %v1550_v25 }
 0x585   : > { %v1590_v35 = vpop.permute.xlu1 %1589 }
 0x586   : > { %v1566_v27 = vadd.f32 %v1564_v29, %v1558_v12  ;;  %v2053_v12 = vld [vmem:[%s2420_s18 + $0x28] sm:$0xff]  ;;  %v2054_v29 = vld [vmem:[%s2420_s18 + $0x20] sm:$0xff] }
 0x588   : > { %v1571_v32 = vadd.f32 %v1570_v26, %v1566_v27 }
 0x589   : > { %v1606_v41 = vpop.permute.xlu1 %1605 }
 0x58a   : > { %v1576_v8 = vadd.f32 %v1575_v28, %v1571_v32  ;;  %v2055_v32 = vld [vmem:[%s2420_s18 + $0x38] sm:$0xff] }
 0x58c   : > { %v1584_v37 = vadd.f32 %v1582_v33, %v1576_v8  ;;  %v2056_v33 = vld [vmem:[%s2420_s18 + $0x30] sm:$0xff] }
 0x58e   : > { %v1592_v38 = vadd.f32 %v1590_v35, %v1584_v37 }
 0x590   : > { %v1600_v63 = vadd.f32 %v1598_v39, %v1592_v38 }
 0x592   : > { %v1608_v42 = vadd.f32 %v1606_v41, %v1600_v63 }
 0x594   : > { %v1611_v45 = vmul.f32 %v1610_v14, %v1608_v42 }
 0x596   : > { %v1614_v43 = vadd.f32 %v1613_v44, %v1611_v45 }
 0x598   : > { %v1880_v46 = vmul.f32 -1.442695, %v1614_v43 }
 0x59a   : > { %2045 = vpow2.f32 %v1880_v46 }
 0x5a4   : > { %v2046_v47 = vpop.eup %2045 }
 0x5a5   : > { %v1618_v48 = vadd.f32 1.0, %v2046_v47 }
 0x5a7   : > { %2047 = vrcp.f32 %v1618_v48 }
 0x5b1   : > { %v2048_v51 = vpop.eup %2047 }
 0x5b2   : > { %v1631_v4 = vrot.slane %v2048_v51, %v1630_v3  ;;  %v1624_v52 = vrot.slane %v2048_v51, %v1301_v40  ;;  %v1645_v21 = vrot.slane %v2048_v51, %v1644_v30  ;;  %v1638_v53 = vrot.slane %v2048_v51, %v1637_v20 }
 0x5b3   : > { %v1659_v57 = vrot.slane %v2048_v51, %v1658_v54  ;;  %v1652_v60 = vrot.slane %v2048_v51, %v1651_v56  ;;  %v1672_v40 = vsub.s32 7, %v2739_v55  ;;  %v1666_v0 = vrot.slane %v2048_v51, %v1665_v34 }
 0x5b4   : > { %1633 = vbcast.lane.b32.xlu1 %v1631_v4, 256  ;;  %1626 = vbcast.lane.b32.xlu0 %v1624_v52, 256 }
 0x5b5   : > { %v1673_v49 = vrot.slane %v2048_v51, %v1672_v40 }
 0x5b8   : > { %1647 = vbcast.lane.b32.xlu1 %v1645_v21, 256  ;;  %1640 = vbcast.lane.b32.xlu0 %v1638_v53, 256 }
 0x5bc   : > { %1661 = vbcast.lane.b32.xlu1 %v1659_v57, 256  ;;  %1654 = vbcast.lane.b32.xlu0 %v1652_v60, 256 }
 0x5c0   : > { %1675 = vbcast.lane.b32.xlu1 %v1673_v49, 256  ;;  %1668 = vbcast.lane.b32.xlu0 %v1666_v0, 256 }
 0x626   : > { %v1634_v22 = vpop.permute.xlu1 %1633  ;;  %v1627_v62 = vpop.permute.xlu0 %1626 }
 0x627   : > { %v1678_v58 = vmul.f32 %v1634_v22, %v2752_v61  ;;  %v1677_v1 = vmul.f32 %v1627_v62, %v2745_v59 }
 0x629   : > { %v1686_v10 = vadd.f32 %v2049_v11, %v1678_v58  ;;  %v1685_v2 = vadd.f32 %v2050_v16, %v1677_v1 }
 0x62a   : > { %v1648_v55 = vpop.permute.xlu1 %1647  ;;  %v1641_v18 = vpop.permute.xlu0 %1640 }
 0x62b   : > { %1694 = vst.msk [vmem:[%s2848_s15 + $0x8] sm:$0xff] %vm515_vm0, %v1686_v10  ;;  %1693 = vst.msk [vmem:[%s2848_s15] sm:$0xff] %vm515_vm0, %v1685_v2  ;;  %v1680_v59 = vmul.f32 %v1648_v55, %v2766_v6  ;;  %v1679_v61 = vmul.f32 %v1641_v18, %v2759_v36 }
 0x62d   : > { %v1688_v19 = vadd.f32 %v2051_v13, %v1680_v59  ;;  %v1687_v15 = vadd.f32 %v2052_v24, %v1679_v61 }
 0x62e   : > { %v1662_v25 = vpop.permute.xlu1 %1661  ;;  %v1655_v5 = vpop.permute.xlu0 %1654 }
 0x62f   : > { %1696 = vst.msk [vmem:[%s2848_s15 + $0x18] sm:$0xff] %vm515_vm0, %v1688_v19  ;;  %1695 = vst.msk [vmem:[%s2848_s15 + $0x10] sm:$0xff] %vm515_vm0, %v1687_v15  ;;  %v1682_v7 = vmul.f32 %v1662_v25, %v2780_v9  ;;  %v1681_v6 = vmul.f32 %v1655_v5, %v2773_v50 }
 0x631   : > { %v1690_v36 = vadd.f32 %v2053_v12, %v1682_v7  ;;  %v1689_v31 = vadd.f32 %v2054_v29, %v1681_v6 }
 0x632   : > { %v1676_v26 = vpop.permute.xlu1 %1675  ;;  %v1669_v27 = vpop.permute.xlu0 %1668 }
 0x633   : > { %1698 = vst.msk [vmem:[%s2848_s15 + $0x28] sm:$0xff] %vm515_vm0, %v1690_v36  ;;  %1697 = vst.msk [vmem:[%s2848_s15 + $0x20] sm:$0xff] %vm515_vm0, %v1689_v31  ;;  %v1684_v9 = vmul.f32 %v1676_v26, %v2794_v23  ;;  %v1683_v50 = vmul.f32 %v1669_v27, %v2787_v17 }
 0x635   : > { %v1692_v28 = vadd.f32 %v2055_v32, %v1684_v9  ;;  %v1691_v8 = vadd.f32 %v2056_v33, %v1683_v50 }
 0x637   : > { %1700 = vst.msk [vmem:[%s2848_s15 + $0x38] sm:$0xff] %vm515_vm0, %v1692_v28  ;;  %1699 = vst.msk [vmem:[%s2848_s15 + $0x30] sm:$0xff] %vm515_vm0, %v1691_v8 }
 0x638   : > { %2130 = shalt.err (!%p2127_p7)
}
 0x639   : > { %s2131_s18 = scalar_lea.hbm %s2877_s12, 1024  ;;  %s2135_s30 = scalar_lea.hbm %s2942_s13, 2048 }
 0x63a   : > { %p2132_p11 = scmp.ne.s32.totalorder %s2877_s12, %s2131_s18  ;;  %p2136_p3 = scmp.lt.u32.totalorder %s2877_s12, %s2942_s13 }
 0x63b   : > { %p2137_p9 = scmp.lt.u32.totalorder %s2135_s30, %s2131_s18  ;;  %p2139_p5 = scmp.lt.u32.totalorder %s2131_s18, %s2877_s12 }
 0x63c   : > { %p2133_p13 = pnand %p2132_p11, %p2976_p2 }
 0x63d   : > { %p2138_p1 = por %p2137_p9, %p2136_p3 }
 0x63e   : > { %p2134_p6 = pneg %p2133_p13 }
 0x63f   : > { %p2140_p8 = por %p2139_p5, %p2138_p1 }
 0x641   : > { %p2141_p10 = pnand %p2140_p8, %p2134_p6 }
 0x643   : > { %2144 = shalt.err (!%p2141_p10)
}
 0x644   : > { %s2204_s11 = smov 128   ;;  %s2205_s25 = smov 8  }
 0x645   : > { %1969 = dma.vmem_to_hbm [thread:$0]  (%p2976_p2), %s2879_s16, 1024, %s2877_s12, %s1702_s29, %s2204_s11, %s2204_s11, %s2205_s25  }
 0x646 PF: > { %s2977_s17 = sld [smem:[#allocation16_spill]]  ;;  %s2978_s27 = sld [smem:[#allocation20_spill]] }
 0x647   : > { %p2980_p12 = scmp.ge.s32.totalorder %s2191_s28, 2 }
 0x64c   : > { %s1730_s21 = sand.u32 1, %s2977_s17   ;;  %p2979_p4 = scmp.ne.s32.totalorder %s2978_s27, 0 }
 0x64d   : > { %s1731_s19 = scalar_lea.sflag [#allocation6], %s1730_s21 }
 0x64e   : > { %p1983_p0 = pnand %p2980_p12, %p2979_p4 }
 0x650   : > { %2174 = dma.done.wait (!%p1983_p0), %s1731_s19, 1024  }
 0x651   : > { %2176 = vsyncadd (!%p1983_p0), %s1731_s19, 4294966272  ;;  %s2981_s28 = sld [smem:[#allocation18_spill]]  ;;  %s2982_s18 = sld [smem:[#allocation17_spill]] }
 0x652   : > { %s2983_s27 = sld [smem:[#allocation19_spill]]  ;;  %s2984_s25 = smov %s2183_s26 }
 0x657   : > { %p28_p7 = scmp.ge.s32.totalorder %s2981_s28, 4   ;;  %s2985_s26 = smov %s2982_s18 }
 0x659   :  { %30 = sbr.rel (!%p28_p7) target bundleno = 10 (0xa), region = 131 }
 0x660   :  { %1736 = vsyncpa [#allocation5], 1 }
 0x661   :  { %1738 = vsyncpa [#allocation5 + $0x1], 1 }
 0x662   :  { %1739 = vsyncpa [#allocation6], 1 }
 0x663   :  { %1741 = vsyncpa [#allocation6 + $0x1], 1 }
 0x664   :  { %1742 = vsyncpa [#allocation7], 1 }
 0x665   :  { %1744 = vsyncpa [#allocation7 + $0x1], 1 }
 0x666   :  { %1745 = vsyncpa [#allocation10], 1 }

</bundles_post_ra>
